<compile_context>
chip_gen: v6e
topology: v6e:2x2x1
jax: 0.10.0
libtpu: 0.0.40
codegen_flags: <defaults>
</compile_context>

<pallas_src>
import jax
import jax.numpy as jnp
from jax import lax
from jax.experimental import pallas as pl
from jax.experimental.pallas import tpu as pltpu

# ---------------------------------------------------------------------------
# Model dimensions (consistent with the module: feature_dim=32, 8 heads, 2
# layers, nn.TransformerEncoderLayer default dim_feedforward=2048).
# ---------------------------------------------------------------------------
BATCH = 2
SEQ = 8
FEATURE_DIM = 32
NUM_HEADS = 8
NUM_LAYERS = 2
DIM_FF = 2048
LN_EPS = 1e-5
HEAD_DIM = FEATURE_DIM // NUM_HEADS

# Row indices inside the packed per-layer vector tensor (L, 8, D).
_BO, _B2, _N1W, _N1B, _N2W, _N2B, _FNW, _FNB = range(8)


def _layernorm(v, w, b):
    mu = jnp.mean(v, axis=-1, keepdims=True)
    var = jnp.mean((v - mu) ** 2, axis=-1, keepdims=True)
    return (v - mu) * lax.rsqrt(var + LN_EPS) * w + b


def _gelu_erf(v):
    return 0.5 * v * (1.0 + lax.erf(v * 0.7071067811865476))


# ---------------------------------------------------------------------------
# Kernel: one grid step == one encoder layer.  The residual stream lives in a
# VMEM scratch; per-layer weights are pipelined via the layer grid axis.
# ---------------------------------------------------------------------------
def _transformer_layer_kernel(
    x_ref,        # (N, D)      f32   input embeddings (resident, loaded once)
    hm_ref,       # (H, 1, D)   bf16  per-head feature masks (constant)
    ab_ref,       # (1, N, N)   f32   block-diag batch bias (constant)
    wqkv_ref,     # (D, 3D)     bf16  fused QKV weights, scale folded into Q
    bqkv_ref,     # (1, 3D)     f32   fused QKV bias, scale folded into Q
    wo_ref,       # (D, D)      bf16
    w1_ref,       # (D, FF)     bf16
    b1_ref,       # (1, FF)     f32
    w2_ref,       # (FF, D)     bf16  canonical (in, out) layout
    vecs_ref,     # (8, D)      f32   packed small vectors
    o_ref,        # (N, D)      f32   output
    xs_ref,       # (N, D)      f32   VMEM scratch: residual stream carry
):
    l = pl.program_id(0)

    @pl.when(l == 0)
    def _():
        xs_ref[...] = x_ref[...]

    x = xs_ref[...]                       # (N, D) f32
    N, D = x.shape
    head_mask = hm_ref[...]               # (H, 1, D) bf16
    H = head_mask.shape[0]
    attn_bias = ab_ref[...]               # (1, N, N) f32
    vecs = vecs_ref[...]                  # (8, D)   f32

    def dot(a, w):
        # a: (M, K) f32 -> bf16 at the MXU boundary; w: (K, Nout) bf16 -> f32 acc
        return lax.dot_general(a.astype(jnp.bfloat16), w,
                               (((1,), (0,)), ((), ())),
                               preferred_element_type=jnp.float32)

    # ---- fused QKV projection (scale already folded into the Q columns) ----
    qkv = dot(x, wqkv_ref[...]) + bqkv_ref[...]          # (N, 3D) f32
    q = qkv[:, 0:D].astype(jnp.bfloat16)
    k = qkv[:, D:2 * D].astype(jnp.bfloat16)
    v = qkv[:, 2 * D:3 * D].astype(jnp.bfloat16)

    # ---- multi-head self attention, all heads/batches in batched einsums ---
    qh = q[None, :, :] * head_mask                       # (H, N, D) bf16
    kh = jnp.broadcast_to(k[None, :, :], (H, N, D))      # (H, N, D) bf16
    vh = v[None, :, :] * head_mask                       # (H, N, D) bf16

    s = jnp.einsum('hqd,hkd->hqk', qh, kh,
                   preferred_element_type=jnp.float32)   # (H, N, N) f32
    s = s + attn_bias                                    # forbid cross-batch
    s = s - jnp.max(s, axis=-1, keepdims=True)
    p = jnp.exp(s)
    p = p / jnp.sum(p, axis=-1, keepdims=True)

    o3 = jnp.einsum('hqk,hkd->hqd', p.astype(jnp.bfloat16), vh,
                    preferred_element_type=jnp.float32)  # (H, N, D) f32
    attn = jnp.sum(o3, axis=0)                           # (N, D)

    attn = dot(attn, wo_ref[...]) + vecs[_BO:_BO + 1, :]
    # post-norm (PyTorch default norm_first=False)
    x = _layernorm(x + attn, vecs[_N1W:_N1W + 1, :], vecs[_N1B:_N1B + 1, :])

    # ---- feed-forward with exact (erf) GELU --------------------------------
    h = dot(x, w1_ref[...]) + b1_ref[...]                # (N, FF) f32
    h = _gelu_erf(h)
    h = dot(h, w2_ref[...]) + vecs[_B2:_B2 + 1, :]       # (N, D)  f32
    x = _layernorm(x + h, vecs[_N2W:_N2W + 1, :], vecs[_N2B:_N2B + 1, :])

    xs_ref[...] = x

    @pl.when(l == pl.num_programs(0) - 1)
    def _():
        o_ref[...] = _layernorm(x, vecs[_FNW:_FNW + 1, :], vecs[_FNB:_FNB + 1, :])


# ---------------------------------------------------------------------------
# Wrapper
# ---------------------------------------------------------------------------
@jax.jit
def unified_multimodal_transformer(x, params):
    """x: [B, S, D] float32 -> [B, S, D] float32."""
    B, S, D = x.shape
    N = B * S
    H = NUM_HEADS
    hd = D // H
    L = params["wqkv"].shape[0]
    FF = params["w1"].shape[-1]

    x2 = x.reshape(N, D)

    # Constant masks (hoisted out of the kernel, constant-folded by XLA).
    head_mask = (jnp.arange(D)[None, None, :] // hd ==
                 jnp.arange(H)[:, None, None]).astype(jnp.bfloat16)    # (H,1,D)
    batch_id = jnp.arange(N) // S
    attn_bias = jnp.where(batch_id[None, :, None] == batch_id[None, None, :],
                          0.0, -1e30).astype(jnp.float32)              # (1,N,N)

    inputs = (x2, head_mask, attn_bias,
              params["wqkv"], params["bqkv"], params["wo"],
              params["w1"], params["b1"], params["w2"], params["vecs"])

    in_specs = [
        pl.BlockSpec((N, D), lambda l: (0, 0)),                    # x (resident)
        pl.BlockSpec((H, 1, D), lambda l: (0, 0, 0)),              # head masks
        pl.BlockSpec((1, N, N), lambda l: (0, 0, 0)),              # batch bias
        pl.BlockSpec((None, D, 3 * D), lambda l: (l, 0, 0)),       # wqkv
        pl.BlockSpec((None, 1, 3 * D), lambda l: (l, 0, 0)),       # bqkv
        pl.BlockSpec((None, D, D), lambda l: (l, 0, 0)),           # wo
        pl.BlockSpec((None, D, FF), lambda l: (l, 0, 0)),          # w1
        pl.BlockSpec((None, 1, FF), lambda l: (l, 0, 0)),          # b1
        pl.BlockSpec((None, FF, D), lambda l: (l, 0, 0)),          # w2
        pl.BlockSpec((None, 8, D), lambda l: (l, 0, 0)),           # packed vecs
    ]

    out = pl.pallas_call(
        _transformer_layer_kernel,
        out_shape=jax.ShapeDtypeStruct((N, D), jnp.float32),
        grid=(L,),
        in_specs=in_specs,
        out_specs=pl.BlockSpec((N, D), lambda l: (0, 0)),
        scratch_shapes=[pltpu.VMEM((N, D), jnp.float32)],
        compiler_params=pltpu.CompilerParams(
            dimension_semantics=("arbitrary",)),   # carried dep across layers
    )(*inputs)
    return out.reshape(B, S, D)


# ---------------------------------------------------------------------------
# Pure-JAX reference (same bf16-weight / bf16-MXU-operand / f32-accumulate
# math, standard per-batch per-head attention) for correctness checking.
# ---------------------------------------------------------------------------
def reference_forward(x, p):
    B, S, D = x.shape
    H, hd = NUM_HEADS, D // NUM_HEADS
    L = p["wqkv"].shape[0]

    def ln(v, w, b):
        mu = v.mean(-1, keepdims=True)
        var = ((v - mu) ** 2).mean(-1, keepdims=True)
        return (v - mu) * lax.rsqrt(var + LN_EPS) * w + b

    def mm(a, w):   # w: (in, out) bf16
        return jnp.dot(a.astype(jnp.bfloat16), w,
                       preferred_element_type=jnp.float32)

    y = x
    for l in range(L):
        vec = p["vecs"][l]
        qkv = mm(y, p["wqkv"][l]) + p["bqkv"][l, 0]
        q, k, v = jnp.split(qkv, 3, axis=-1)
        q = q.reshape(B, S, H, hd).transpose(0, 2, 1, 3).astype(jnp.bfloat16)
        k = k.reshape(B, S, H, hd).transpose(0, 2, 1, 3).astype(jnp.bfloat16)
        v = v.reshape(B, S, H, hd).transpose(0, 2, 1, 3).astype(jnp.bfloat16)
        s = jnp.einsum("bhqd,bhkd->bhqk", q, k,
                       preferred_element_type=jnp.float32)
        a = jax.nn.softmax(s, axis=-1)
        o = jnp.einsum("bhqk,bhkd->bhqd", a.astype(jnp.bfloat16), v,
                       preferred_element_type=jnp.float32)
        o = o.transpose(0, 2, 1, 3).reshape(B, S, D)
        o = mm(o, p["wo"][l]) + vec[_BO]
        y = ln(y + o, vec[_N1W], vec[_N1B])
        h = mm(y, p["w1"][l]) + p["b1"][l, 0]
        h = _gelu_erf(h)
        h = mm(h, p["w2"][l]) + vec[_B2]
        y = ln(y + h, vec[_N2W], vec[_N2B])
    return ln(y, p["vecs"][-1, _FNW], p["vecs"][-1, _FNB])


# ---------------------------------------------------------------------------
# Deterministic synthetic parameters, generated directly in the kernel layout:
#   wqkv : (L, D, 3D) bf16, (in, out), 1/sqrt(head_dim) folded into Q columns
#   bqkv : (L, 1, 3D) f32, same folding
#   wo   : (L, D, D)  bf16 (in, out)
#   w1   : (L, D, FF) bf16 (in, out);  b1 : (L, 1, FF) f32
#   w2   : (L, FF, D) bf16 (in, out)
#   vecs : (L, 8, D)  f32 = [bo, b2, n1w, n1b, n2w, n2b, fnw, fnb]
# (Real nn.Linear weights would simply be transposed/fused this way host-side.)
# ---------------------------------------------------------------------------
def init_params(key, L=NUM_LAYERS, D=FEATURE_DIM, FF=DIM_FF, H=NUM_HEADS):
    hd = D // H
    scale = 1.0 / (hd ** 0.5)
    ks = jax.random.split(key, 12)

    def w(k, shape):
        return jax.random.normal(k, shape, jnp.float32) * 0.05

    wq, wk, wv = w(ks[0], (L, D, D)), w(ks[1], (L, D, D)), w(ks[2], (L, D, D))
    bq, bk, bv = w(ks[3], (L, D)), w(ks[4], (L, D)), w(ks[5], (L, D))
    wo, bo = w(ks[6], (L, D, D)), w(ks[7], (L, D))
    w1, b1 = w(ks[8], (L, D, FF)), w(ks[9], (L, FF))
    w2, b2 = w(ks[10], (L, FF, D)), w(ks[11], (L, D))
    n1w, n1b = jnp.ones((L, D), jnp.float32), jnp.zeros((L, D), jnp.float32)
    n2w, n2b = jnp.ones((L, D), jnp.float32), jnp.zeros((L, D), jnp.float32)
    fnw, fnb = jnp.ones((D,), jnp.float32), jnp.zeros((D,), jnp.float32)

    wqkv = jnp.concatenate([wq * scale, wk, wv], axis=-1).astype(jnp.bfloat16)
    bqkv = jnp.concatenate([bq * scale, bk, bv], axis=-1).reshape(L, 1, 3 * D)
    vecs = jnp.stack([bo, b2, n1w, n1b, n2w, n2b,
                      jnp.broadcast_to(fnw, (L, D)),
                      jnp.broadcast_to(fnb, (L, D))], axis=1)        # (L, 8, D)

    return dict(
        wqkv=wqkv, bqkv=bqkv,
        wo=wo.astype(jnp.bfloat16),
        w1=w1.astype(jnp.bfloat16), b1=b1.reshape(L, 1, FF),
        w2=w2.astype(jnp.bfloat16),
        vecs=vecs,
    )


if __name__ == "__main__":
    root = jax.random.PRNGKey(0)
    k_x, k_p = jax.random.split(root)

    x = jax.random.normal(k_x, (BATCH, SEQ, FEATURE_DIM), jnp.float32)
    params = init_params(k_p)

    out = jax.block_until_ready(unified_multimodal_transformer(x, params))
    ref = jax.block_until_ready(reference_forward(x, params))

    assert out.shape == (BATCH, SEQ, FEATURE_DIM)
    assert bool(jnp.all(jnp.isfinite(out)))
    assert jnp.allclose(out, ref, atol=2e-3, rtol=2e-3)

    print("KERNEL_OK")
</pallas_src>

<mosaic_0001>
module attributes {stable_mosaic.version = 11 : i64} {
  func.func @_transformer_layer_kernel(%arg0: i32, %arg1: memref<16x32xf32, #tpu.memory_space<vmem>>, %arg2: memref<8x1x32xbf16, #tpu.memory_space<vmem>>, %arg3: memref<1x16x16xf32, #tpu.memory_space<vmem>>, %arg4: memref<1x32x96xbf16, #tpu.memory_space<vmem>>, %arg5: memref<1x1x96xf32, #tpu.memory_space<vmem>>, %arg6: memref<1x32x32xbf16, #tpu.memory_space<vmem>>, %arg7: memref<1x32x2048xbf16, #tpu.memory_space<vmem>>, %arg8: memref<1x1x2048xf32, #tpu.memory_space<vmem>>, %arg9: memref<1x2048x32xbf16, #tpu.memory_space<vmem>>, %arg10: memref<1x8x32xf32, #tpu.memory_space<vmem>>, %arg11: memref<16x32xf32, #tpu.memory_space<vmem>>, %arg12: memref<16x32xf32, #tpu.memory_space<vmem>>) attributes {dimension_semantics = [#tpu.dimension_semantics<arbitrary>], iteration_bounds = array<i64: 2>, scalar_prefetch = 0 : i64, scratch_operands = 1 : i64, tpu.core_type = #tpu.core_type<tc>, window_params = [{pipeline_mode = #tpu.pipeline_mode<synchronous>, transform_indices = @transform_0, window_bounds = array<i64: 16, 32>}, {pipeline_mode = #tpu.pipeline_mode<synchronous>, transform_indices = @transform_1, window_bounds = array<i64: 8, 1, 32>}, {pipeline_mode = #tpu.pipeline_mode<synchronous>, transform_indices = @transform_2, window_bounds = array<i64: 1, 16, 16>}, {transform_indices = @transform_3, window_bounds = array<i64: 1, 32, 96>}, {transform_indices = @transform_4, window_bounds = array<i64: 1, 1, 96>}, {transform_indices = @transform_5, window_bounds = array<i64: 1, 32, 32>}, {transform_indices = @transform_6, window_bounds = array<i64: 1, 32, 2048>}, {transform_indices = @transform_7, window_bounds = array<i64: 1, 1, 2048>}, {transform_indices = @transform_8, window_bounds = array<i64: 1, 2048, 32>}, {transform_indices = @transform_9, window_bounds = array<i64: 1, 8, 32>}, {pipeline_mode = #tpu.pipeline_mode<synchronous>, transform_indices = @transform_10, window_bounds = array<i64: 16, 32>}]} {
    %c0_i32 = arith.constant 0 : i32
    %0 = arith.cmpi eq, %arg0, %c0_i32 : i32
    %1 = arith.extui %0 : i1 to i32
    %c0_i32_0 = arith.constant 0 : i32
    %2 = arith.cmpi ne, %1, %c0_i32_0 : i32
    scf.if %2 {
      %c0_53 = arith.constant 0 : index
      %c0_54 = arith.constant 0 : index
      %132 = vector.load %arg1[%c0_53, %c0_54] : memref<16x32xf32, #tpu.memory_space<vmem>>, vector<16x32xf32>
      %c0_55 = arith.constant 0 : index
      %c0_56 = arith.constant 0 : index
      %133 = vector.load %arg12[%c0_55, %c0_56] : memref<16x32xf32, #tpu.memory_space<vmem>>, vector<16x32xf32>
      tpu.vector_store %arg12[%c0_55, %c0_56], %132 {strides = array<i32>} : memref<16x32xf32, #tpu.memory_space<vmem>>, vector<16x32xf32>,
    } else {
    }
    %c0 = arith.constant 0 : index
    %c0_1 = arith.constant 0 : index
    %3 = vector.load %arg12[%c0, %c0_1] : memref<16x32xf32, #tpu.memory_space<vmem>>, vector<16x32xf32>
    %c0_2 = arith.constant 0 : index
    %c0_3 = arith.constant 0 : index
    %c0_4 = arith.constant 0 : index
    %4 = vector.load %arg2[%c0_2, %c0_3, %c0_4] : memref<8x1x32xbf16, #tpu.memory_space<vmem>>, vector<8x1x32xbf16>
    %c0_5 = arith.constant 0 : index
    %c0_6 = arith.constant 0 : index
    %c0_7 = arith.constant 0 : index
    %5 = vector.load %arg3[%c0_5, %c0_6, %c0_7] : memref<1x16x16xf32, #tpu.memory_space<vmem>>, vector<1x16x16xf32>
    %c0_8 = arith.constant 0 : index
    %c0_9 = arith.constant 0 : index
    %c0_10 = arith.constant 0 : index
    %6 = vector.load %arg10[%c0_8, %c0_9, %c0_10] : memref<1x8x32xf32, #tpu.memory_space<vmem>>, vector<1x8x32xf32>
    %7 = vector.shape_cast %6 : vector<1x8x32xf32> to vector<8x32xf32>
    %c0_11 = arith.constant 0 : index
    %c0_12 = arith.constant 0 : index
    %c0_13 = arith.constant 0 : index
    %8 = vector.load %arg4[%c0_11, %c0_12, %c0_13] : memref<1x32x96xbf16, #tpu.memory_space<vmem>>, vector<1x32x96xbf16>
    %9 = vector.shape_cast %8 : vector<1x32x96xbf16> to vector<32x96xbf16>
    %10 = arith.truncf %3 : vector<16x32xf32> to vector<16x32xbf16>
    %cst = arith.constant dense<0.000000e+00> : vector<16x96xf32>
    %11 = tpu.matmul %10, %9, %cst {dimension_numbers = #tpu.dot_dimension_numbers<[1], [0], [0], [1], [0, 0, 1, 1], [], []>} : vector<16x32xbf16>, vector<32x96xbf16>, vector<16x96xf32> -> vector<16x96xf32>
    %c0_14 = arith.constant 0 : index
    %c0_15 = arith.constant 0 : index
    %c0_16 = arith.constant 0 : index
    %12 = vector.load %arg5[%c0_14, %c0_15, %c0_16] : memref<1x1x96xf32, #tpu.memory_space<vmem>>, vector<1x1x96xf32>
    %13 = vector.shape_cast %12 : vector<1x1x96xf32> to vector<1x96xf32>
    %14 = vector.broadcast %13 : vector<1x96xf32> to vector<16x96xf32>
    %15 = arith.addf %11, %14 : vector<16x96xf32>
    %16 = vector.extract_strided_slice %15 {offsets = [0, 0], sizes = [16, 32], strides = [1, 1]} : vector<16x96xf32> to vector<16x32xf32>
    %17 = arith.truncf %16 : vector<16x32xf32> to vector<16x32xbf16>
    %18 = vector.extract_strided_slice %15 {offsets = [0, 32], sizes = [16, 32], strides = [1, 1]} : vector<16x96xf32> to vector<16x32xf32>
    %19 = arith.truncf %18 : vector<16x32xf32> to vector<16x32xbf16>
    %20 = vector.extract_strided_slice %15 {offsets = [0, 64], sizes = [16, 32], strides = [1, 1]} : vector<16x96xf32> to vector<16x32xf32>
    %21 = arith.truncf %20 : vector<16x32xf32> to vector<16x32xbf16>
    %22 = vector.shape_cast %17 : vector<16x32xbf16> to vector<1x16x32xbf16>
    %23 = vector.broadcast %22 : vector<1x16x32xbf16> to vector<8x16x32xbf16>
    %24 = vector.broadcast %4 : vector<8x1x32xbf16> to vector<8x16x32xbf16>
    %25 = arith.mulf %23, %24 : vector<8x16x32xbf16>
    %26 = vector.shape_cast %19 : vector<16x32xbf16> to vector<1x16x32xbf16>
    %27 = vector.shape_cast %26 : vector<1x16x32xbf16> to vector<1x16x32xbf16>
    %28 = vector.broadcast %27 : vector<1x16x32xbf16> to vector<8x16x32xbf16>
    %29 = vector.shape_cast %21 : vector<16x32xbf16> to vector<1x16x32xbf16>
    %30 = vector.broadcast %29 : vector<1x16x32xbf16> to vector<8x16x32xbf16>
    %31 = vector.broadcast %4 : vector<8x1x32xbf16> to vector<8x16x32xbf16>
    %32 = arith.mulf %30, %31 : vector<8x16x32xbf16>
    "tpu.trace_start"() <{level = 10 : i32, message = "hqd,hkd->hqk"}> : () -> ()
    %cst_17 = arith.constant dense<0.000000e+00> : vector<8x16x16xf32>
    %33 = tpu.matmul %25, %28, %cst_17 {dimension_numbers = #tpu.dot_dimension_numbers<[2], [2], [1], [1], [0, 0, 0, 1, 1, 1], [0], [0]>} : vector<8x16x32xbf16>, vector<8x16x32xbf16>, vector<8x16x16xf32> -> vector<8x16x16xf32>
    "tpu.trace_stop"() : () -> ()
    %34 = vector.broadcast %5 : vector<1x16x16xf32> to vector<8x16x16xf32>
    %35 = arith.addf %33, %34 : vector<8x16x16xf32>
    %cst_18 = arith.constant dense<0xFF800000> : vector<8x16xf32>
    %36 = vector.multi_reduction <maximumf>, %35, %cst_18 [2] : vector<8x16x16xf32> to vector<8x16xf32>
    %37 = vector.shape_cast %36 : vector<8x16xf32> to vector<8x16x1xf32>
    %38 = vector.broadcast %37 : vector<8x16x1xf32> to vector<8x16x16xf32>
    %39 = arith.subf %35, %38 : vector<8x16x16xf32>
    %40 = math.exp %39 : vector<8x16x16xf32>
    %cst_19 = arith.constant dense<0.000000e+00> : vector<8x16xf32>
    %41 = vector.multi_reduction <add>, %40, %cst_19 [2] : vector<8x16x16xf32> to vector<8x16xf32>
    %42 = vector.shape_cast %41 : vector<8x16xf32> to vector<8x16x1xf32>
    %43 = vector.broadcast %42 : vector<8x16x1xf32> to vector<8x16x16xf32>
    %44 = arith.divf %40, %43 : vector<8x16x16xf32>
    %45 = arith.truncf %44 : vector<8x16x16xf32> to vector<8x16x16xbf16>
    "tpu.trace_start"() <{level = 10 : i32, message = "hqk,hkd->hqd"}> : () -> ()
    %cst_20 = arith.constant dense<0.000000e+00> : vector<8x16x32xf32>
    %46 = tpu.matmul %45, %32, %cst_20 {dimension_numbers = #tpu.dot_dimension_numbers<[2], [1], [1], [2], [0, 0, 0, 1, 1, 2], [0], [0]>} : vector<8x16x16xbf16>, vector<8x16x32xbf16>, vector<8x16x32xf32> -> vector<8x16x32xf32>
    "tpu.trace_stop"() : () -> ()
    %cst_21 = arith.constant dense<0.000000e+00> : vector<16x32xf32>
    %47 = vector.multi_reduction <add>, %46, %cst_21 [0] : vector<8x16x32xf32> to vector<16x32xf32>
    %c0_22 = arith.constant 0 : index
    %c0_23 = arith.constant 0 : index
    %c0_24 = arith.constant 0 : index
    %48 = vector.load %arg6[%c0_22, %c0_23, %c0_24] : memref<1x32x32xbf16, #tpu.memory_space<vmem>>, vector<1x32x32xbf16>
    %49 = vector.shape_cast %48 : vector<1x32x32xbf16> to vector<32x32xbf16>
    %50 = arith.truncf %47 : vector<16x32xf32> to vector<16x32xbf16>
    %cst_25 = arith.constant dense<0.000000e+00> : vector<16x32xf32>
    %51 = tpu.matmul %50, %49, %cst_25 {dimension_numbers = #tpu.dot_dimension_numbers<[1], [0], [0], [1], [0, 0, 1, 1], [], []>} : vector<16x32xbf16>, vector<32x32xbf16>, vector<16x32xf32> -> vector<16x32xf32>
    %52 = vector.extract_strided_slice %7 {offsets = [0, 0], sizes = [1, 32], strides = [1, 1]} : vector<8x32xf32> to vector<1x32xf32>
    %53 = vector.broadcast %52 : vector<1x32xf32> to vector<16x32xf32>
    %54 = arith.addf %51, %53 : vector<16x32xf32>
    %55 = arith.addf %3, %54 : vector<16x32xf32>
    %56 = vector.extract_strided_slice %7 {offsets = [2, 0], sizes = [1, 32], strides = [1, 1]} : vector<8x32xf32> to vector<1x32xf32>
    %57 = vector.extract_strided_slice %7 {offsets = [3, 0], sizes = [1, 32], strides = [1, 1]} : vector<8x32xf32> to vector<1x32xf32>
    %cst_26 = arith.constant dense<0.000000e+00> : vector<16xf32>
    %58 = vector.multi_reduction <add>, %55, %cst_26 [1] : vector<16x32xf32> to vector<16xf32>
    %59 = vector.shape_cast %58 : vector<16xf32> to vector<16x1xf32>
    %cst_27 = arith.constant 3.200000e+01 : f32
    %60 = vector.broadcast %cst_27 : f32 to vector<16x1xf32>
    %61 = arith.divf %59, %60 : vector<16x1xf32>
    %62 = vector.broadcast %61 : vector<16x1xf32> to vector<16x32xf32>
    %63 = arith.subf %55, %62 : vector<16x32xf32>
    %64 = arith.mulf %63, %63 : vector<16x32xf32>
    %cst_28 = arith.constant dense<0.000000e+00> : vector<16xf32>
    %65 = vector.multi_reduction <add>, %64, %cst_28 [1] : vector<16x32xf32> to vector<16xf32>
    %66 = vector.shape_cast %65 : vector<16xf32> to vector<16x1xf32>
    %cst_29 = arith.constant 3.200000e+01 : f32
    %67 = vector.broadcast %cst_29 : f32 to vector<16x1xf32>
    %68 = arith.divf %66, %67 : vector<16x1xf32>
    %69 = vector.broadcast %61 : vector<16x1xf32> to vector<16x32xf32>
    %70 = arith.subf %55, %69 : vector<16x32xf32>
    %cst_30 = arith.constant 9.99999974E-6 : f32
    %71 = vector.broadcast %cst_30 : f32 to vector<16x1xf32>
    %72 = arith.addf %68, %71 : vector<16x1xf32>
    %73 = math.rsqrt %72 : vector<16x1xf32>
    %74 = vector.broadcast %73 : vector<16x1xf32> to vector<16x32xf32>
    %75 = arith.mulf %70, %74 : vector<16x32xf32>
    %76 = vector.broadcast %56 : vector<1x32xf32> to vector<16x32xf32>
    %77 = arith.mulf %75, %76 : vector<16x32xf32>
    %78 = vector.broadcast %57 : vector<1x32xf32> to vector<16x32xf32>
    %79 = arith.addf %77, %78 : vector<16x32xf32>
    %c0_31 = arith.constant 0 : index
    %c0_32 = arith.constant 0 : index
    %c0_33 = arith.constant 0 : index
    %80 = vector.load %arg7[%c0_31, %c0_32, %c0_33] : memref<1x32x2048xbf16, #tpu.memory_space<vmem>>, vector<1x32x2048xbf16>
    %81 = vector.shape_cast %80 : vector<1x32x2048xbf16> to vector<32x2048xbf16>
    %82 = arith.truncf %79 : vector<16x32xf32> to vector<16x32xbf16>
    %cst_34 = arith.constant dense<0.000000e+00> : vector<16x2048xf32>
    %83 = tpu.matmul %82, %81, %cst_34 {dimension_numbers = #tpu.dot_dimension_numbers<[1], [0], [0], [1], [0, 0, 1, 1], [], []>} : vector<16x32xbf16>, vector<32x2048xbf16>, vector<16x2048xf32> -> vector<16x2048xf32>
    %c0_35 = arith.constant 0 : index
    %c0_36 = arith.constant 0 : index
    %c0_37 = arith.constant 0 : index
    %84 = vector.load %arg8[%c0_35, %c0_36, %c0_37] : memref<1x1x2048xf32, #tpu.memory_space<vmem>>, vector<1x1x2048xf32>
    %85 = vector.shape_cast %84 : vector<1x1x2048xf32> to vector<1x2048xf32>
    %86 = vector.broadcast %85 : vector<1x2048xf32> to vector<16x2048xf32>
    %87 = arith.addf %83, %86 : vector<16x2048xf32>
    %cst_38 = arith.constant 5.000000e-01 : f32
    %88 = vector.broadcast %cst_38 : f32 to vector<16x2048xf32>
    %89 = arith.mulf %88, %87 : vector<16x2048xf32>
    %cst_39 = arith.constant 0.707106769 : f32
    %90 = vector.broadcast %cst_39 : f32 to vector<16x2048xf32>
    %91 = arith.mulf %87, %90 : vector<16x2048xf32>
    %92 = math.erf %91 : vector<16x2048xf32>
    %cst_40 = arith.constant 1.000000e+00 : f32
    %93 = vector.broadcast %cst_40 : f32 to vector<16x2048xf32>
    %94 = arith.addf %93, %92 : vector<16x2048xf32>
    %95 = arith.mulf %89, %94 : vector<16x2048xf32>
    %c0_41 = arith.constant 0 : index
    %c0_42 = arith.constant 0 : index
    %c0_43 = arith.constant 0 : index
    %96 = vector.load %arg9[%c0_41, %c0_42, %c0_43] : memref<1x2048x32xbf16, #tpu.memory_space<vmem>>, vector<1x2048x32xbf16>
    %97 = vector.shape_cast %96 : vector<1x2048x32xbf16> to vector<2048x32xbf16>
    %98 = arith.truncf %95 : vector<16x2048xf32> to vector<16x2048xbf16>
    %cst_44 = arith.constant dense<0.000000e+00> : vector<16x32xf32>
    %99 = tpu.matmul %98, %97, %cst_44 {dimension_numbers = #tpu.dot_dimension_numbers<[1], [0], [0], [1], [0, 0, 1, 1], [], []>} : vector<16x2048xbf16>, vector<2048x32xbf16>, vector<16x32xf32> -> vector<16x32xf32>
    %100 = vector.extract_strided_slice %7 {offsets = [1, 0], sizes = [1, 32], strides = [1, 1]} : vector<8x32xf32> to vector<1x32xf32>
    %101 = vector.broadcast %100 : vector<1x32xf32> to vector<16x32xf32>
    %102 = arith.addf %99, %101 : vector<16x32xf32>
    %103 = arith.addf %79, %102 : vector<16x32xf32>
    %104 = vector.extract_strided_slice %7 {offsets = [4, 0], sizes = [1, 32], strides = [1, 1]} : vector<8x32xf32> to vector<1x32xf32>
    %105 = vector.extract_strided_slice %7 {offsets = [5, 0], sizes = [1, 32], strides = [1, 1]} : vector<8x32xf32> to vector<1x32xf32>
    %cst_45 = arith.constant dense<0.000000e+00> : vector<16xf32>
    %106 = vector.multi_reduction <add>, %103, %cst_45 [1] : vector<16x32xf32> to vector<16xf32>
    %107 = vector.shape_cast %106 : vector<16xf32> to vector<16x1xf32>
    %cst_46 = arith.constant 3.200000e+01 : f32
    %108 = vector.broadcast %cst_46 : f32 to vector<16x1xf32>
    %109 = arith.divf %107, %108 : vector<16x1xf32>
    %110 = vector.broadcast %109 : vector<16x1xf32> to vector<16x32xf32>
    %111 = arith.subf %103, %110 : vector<16x32xf32>
    %112 = arith.mulf %111, %111 : vector<16x32xf32>
    %cst_47 = arith.constant dense<0.000000e+00> : vector<16xf32>
    %113 = vector.multi_reduction <add>, %112, %cst_47 [1] : vector<16x32xf32> to vector<16xf32>
    %114 = vector.shape_cast %113 : vector<16xf32> to vector<16x1xf32>
    %cst_48 = arith.constant 3.200000e+01 : f32
    %115 = vector.broadcast %cst_48 : f32 to vector<16x1xf32>
    %116 = arith.divf %114, %115 : vector<16x1xf32>
    %117 = vector.broadcast %109 : vector<16x1xf32> to vector<16x32xf32>
    %118 = arith.subf %103, %117 : vector<16x32xf32>
    %cst_49 = arith.constant 9.99999974E-6 : f32
    %119 = vector.broadcast %cst_49 : f32 to vector<16x1xf32>
    %120 = arith.addf %116, %119 : vector<16x1xf32>
    %121 = math.rsqrt %120 : vector<16x1xf32>
    %122 = vector.broadcast %121 : vector<16x1xf32> to vector<16x32xf32>
    %123 = arith.mulf %118, %122 : vector<16x32xf32>
    %124 = vector.broadcast %104 : vector<1x32xf32> to vector<16x32xf32>
    %125 = arith.mulf %123, %124 : vector<16x32xf32>
    %126 = vector.broadcast %105 : vector<1x32xf32> to vector<16x32xf32>
    %127 = arith.addf %125, %126 : vector<16x32xf32>
    %c0_50 = arith.constant 0 : index
    %c0_51 = arith.constant 0 : index
    %128 = vector.load %arg12[%c0_50, %c0_51] : memref<16x32xf32, #tpu.memory_space<vmem>>, vector<16x32xf32>
    tpu.vector_store %arg12[%c0_50, %c0_51], %127 {strides = array<i32>} : memref<16x32xf32, #tpu.memory_space<vmem>>, vector<16x32xf32>,
    %c1_i32 = arith.constant 1 : i32
    %129 = arith.cmpi eq, %arg0, %c1_i32 : i32
    %130 = arith.extui %129 : i1 to i32
    %c0_i32_52 = arith.constant 0 : i32
    %131 = arith.cmpi ne, %130, %c0_i32_52 : i32
    scf.if %131 {
      %132 = vector.extract_strided_slice %7 {offsets = [6, 0], sizes = [1, 32], strides = [1, 1]} : vector<8x32xf32> to vector<1x32xf32>
      %133 = vector.extract_strided_slice %7 {offsets = [7, 0], sizes = [1, 32], strides = [1, 1]} : vector<8x32xf32> to vector<1x32xf32>
      %cst_53 = arith.constant dense<0.000000e+00> : vector<16xf32>
      %134 = vector.multi_reduction <add>, %127, %cst_53 [1] : vector<16x32xf32> to vector<16xf32>
      %135 = vector.shape_cast %134 : vector<16xf32> to vector<16x1xf32>
      %cst_54 = arith.constant 3.200000e+01 : f32
      %136 = vector.broadcast %cst_54 : f32 to vector<16x1xf32>
      %137 = arith.divf %135, %136 : vector<16x1xf32>
      %138 = vector.broadcast %137 : vector<16x1xf32> to vector<16x32xf32>
      %139 = arith.subf %127, %138 : vector<16x32xf32>
      %140 = arith.mulf %139, %139 : vector<16x32xf32>
      %cst_55 = arith.constant dense<0.000000e+00> : vector<16xf32>
      %141 = vector.multi_reduction <add>, %140, %cst_55 [1] : vector<16x32xf32> to vector<16xf32>
      %142 = vector.shape_cast %141 : vector<16xf32> to vector<16x1xf32>
      %cst_56 = arith.constant 3.200000e+01 : f32
      %143 = vector.broadcast %cst_56 : f32 to vector<16x1xf32>
      %144 = arith.divf %142, %143 : vector<16x1xf32>
      %145 = vector.broadcast %137 : vector<16x1xf32> to vector<16x32xf32>
      %146 = arith.subf %127, %145 : vector<16x32xf32>
      %cst_57 = arith.constant 9.99999974E-6 : f32
      %147 = vector.broadcast %cst_57 : f32 to vector<16x1xf32>
      %148 = arith.addf %144, %147 : vector<16x1xf32>
      %149 = math.rsqrt %148 : vector<16x1xf32>
      %150 = vector.broadcast %149 : vector<16x1xf32> to vector<16x32xf32>
      %151 = arith.mulf %146, %150 : vector<16x32xf32>
      %152 = vector.broadcast %132 : vector<1x32xf32> to vector<16x32xf32>
      %153 = arith.mulf %151, %152 : vector<16x32xf32>
      %154 = vector.broadcast %133 : vector<1x32xf32> to vector<16x32xf32>
      %155 = arith.addf %153, %154 : vector<16x32xf32>
      %c0_58 = arith.constant 0 : index
      %c0_59 = arith.constant 0 : index
      %156 = vector.load %arg11[%c0_58, %c0_59] : memref<16x32xf32, #tpu.memory_space<vmem>>, vector<16x32xf32>
      tpu.vector_store %arg11[%c0_58, %c0_59], %155 {strides = array<i32>} : memref<16x32xf32, #tpu.memory_space<vmem>>, vector<16x32xf32>,
    } else {
    }
    return
  }
  func.func @transform_0(%arg0: i32) -> (i32, i32) {
    %c0_i32 = arith.constant 0 : i32
    %c0_i32_0 = arith.constant 0 : i32
    %c0_i32_1 = arith.constant 0 : i32
    return %c0_i32, %c0_i32_0 : i32, i32
  }
  func.func @transform_1(%arg0: i32) -> (i32, i32, i32) {
    %c0_i32 = arith.constant 0 : i32
    %c0_i32_0 = arith.constant 0 : i32
    %c0_i32_1 = arith.constant 0 : i32
    %c0_i32_2 = arith.constant 0 : i32
    return %c0_i32, %c0_i32_0, %c0_i32_1 : i32, i32, i32
  }
  func.func @transform_2(%arg0: i32) -> (i32, i32, i32) {
    %c0_i32 = arith.constant 0 : i32
    %c0_i32_0 = arith.constant 0 : i32
    %c0_i32_1 = arith.constant 0 : i32
    %c0_i32_2 = arith.constant 0 : i32
    return %c0_i32, %c0_i32_0, %c0_i32_1 : i32, i32, i32
  }
  func.func @transform_3(%arg0: i32) -> (i32, i32, i32) {
    %c0_i32 = arith.constant 0 : i32
    %c0_i32_0 = arith.constant 0 : i32
    %c0_i32_1 = arith.constant 0 : i32
    return %arg0, %c0_i32, %c0_i32_0 : i32, i32, i32
  }
  func.func @transform_4(%arg0: i32) -> (i32, i32, i32) {
    %c0_i32 = arith.constant 0 : i32
    %c0_i32_0 = arith.constant 0 : i32
    %c0_i32_1 = arith.constant 0 : i32
    return %arg0, %c0_i32, %c0_i32_0 : i32, i32, i32
  }
  func.func @transform_5(%arg0: i32) -> (i32, i32, i32) {
    %c0_i32 = arith.constant 0 : i32
    %c0_i32_0 = arith.constant 0 : i32
    %c0_i32_1 = arith.constant 0 : i32
    return %arg0, %c0_i32, %c0_i32_0 : i32, i32, i32
  }
  func.func @transform_6(%arg0: i32) -> (i32, i32, i32) {
    %c0_i32 = arith.constant 0 : i32
    %c0_i32_0 = arith.constant 0 : i32
    %c0_i32_1 = arith.constant 0 : i32
    return %arg0, %c0_i32, %c0_i32_0 : i32, i32, i32
  }
  func.func @transform_7(%arg0: i32) -> (i32, i32, i32) {
    %c0_i32 = arith.constant 0 : i32
    %c0_i32_0 = arith.constant 0 : i32
    %c0_i32_1 = arith.constant 0 : i32
    return %arg0, %c0_i32, %c0_i32_0 : i32, i32, i32
  }
  func.func @transform_8(%arg0: i32) -> (i32, i32, i32) {
    %c0_i32 = arith.constant 0 : i32
    %c0_i32_0 = arith.constant 0 : i32
    %c0_i32_1 = arith.constant 0 : i32
    return %arg0, %c0_i32, %c0_i32_0 : i32, i32, i32
  }
  func.func @transform_9(%arg0: i32) -> (i32, i32, i32) {
    %c0_i32 = arith.constant 0 : i32
    %c0_i32_0 = arith.constant 0 : i32
    %c0_i32_1 = arith.constant 0 : i32
    return %arg0, %c0_i32, %c0_i32_0 : i32, i32, i32
  }
  func.func @transform_10(%arg0: i32) -> (i32, i32) {
    %c0_i32 = arith.constant 0 : i32
    %c0_i32_0 = arith.constant 0 : i32
    %c0_i32_1 = arith.constant 0 : i32
    return %c0_i32, %c0_i32_0 : i32, i32
  }
}

</mosaic_0001>

<bundles_post_ra>
// kernel: unified_multimodal_transformer.1
= control target key start
LH: loop header
LB: loop body
LE: loop exit
PB: predicated region body
PF: predicated region fallthrough
CT: control target
= control target key end

     0   :  { %s5910_s0 = inlined_call_operand.vmem [shape: f32[16,32], index: 0, kind: input, shape index: {}]   ;;  %s5911_s1 = inlined_call_operand.vmem [shape: bf16[8,1,32], index: 1, kind: input, shape index: {}]   ;;  %s5912_s2 = inlined_call_operand.vmem [shape: f32[1,16,16], index: 2, kind: input, shape index: {}]   ;;  %s5913_s3 = inlined_call_operand.vmem [shape: bf16[2,32,96], index: 3, kind: input, shape index: {}]   ;;  %s5914_s4 = inlined_call_operand.vmem [shape: f32[2,1,96], index: 4, kind: input, shape index: {}]   ;;  %s5915_s5 = inlined_call_operand.vmem [shape: bf16[2,32,32], index: 5, kind: input, shape index: {}]   ;;  %s5916_s6 = inlined_call_operand.vmem [shape: bf16[2,32,2048], index: 6, kind: input, shape index: {}]   ;;  %s5917_s7 = inlined_call_operand.vmem [shape: f32[2,1,2048], index: 7, kind: input, shape index: {}]   ;;  %s5918_s8 = inlined_call_operand.vmem [shape: bf16[2,2048,32], index: 8, kind: input, shape index: {}]   ;;  %s5919_s9 = inlined_call_operand.vmem [shape: f32[2,8,32], index: 9, kind: input, shape index: {}]   ;;  %s5920_s10 = inlined_call_operand.hbm [shape: f32[16,32], index: 10, kind: output, shape index: {}]  }
   0x1   :  { %5921 = sst [smem:[#allocation6_spill]] %s5913_s3 }
   0x2   :  { %15 = vsyncpa [#allocation4], 0  ;;  %s5010_s13 = smov 0  }
   0x3 LB: > { %s5016_s14 = sadd.s32 4294967295, %s4945_s13   ;;  %p4076_p0 = scmp.ge.s32.totalorder %s4945_s13, 1  ;;  %s4945_s13 = sphi %s5010_s13, %s21_s13  }
   0x4   : > { %p364_p1 = scmp.lt.s32.totalorder %s4945_s13, 3 }
   0x6   : > { %p365_p2 = pnand %p4076_p0, %p364_p1 }
   0x7   : > { %p423_p3 = scmp.lt.s32.totalorder (!%p365_p2), %s5016_s14, 1  ;;  %s5922_s3 = sld [smem:[#allocation6_spill]] (!%p365_p2) }
   0x8   : > { %368 = sbr.rel (%p365_p2) target bundleno = 2814 (0xafe), region = 60  ;;  %p4087_p4 = scmp.ne.s32.totalorder (!%p365_p2), %s5016_s14, 0 }
   0xd   : > { %s5022_s15 = scalar_select %p423_p3, %s5016_s14, 1 }
   0xf   : > { %s4284_s16 = sshll.u32 %s5022_s15, 4  ;;  %s4286_s26 = sshll.u32 %s5022_s15, 8 }
  0x10   : > { %s427_s22 = scalar_lea.vmem %s5922_s3, %s4284_s16  ;;  %s5035_s25 = scalar_lea.vmem %s5915_s5, %s4284_s16 }
  0x11   : > { %s5041_s29 = scalar_lea.vmem %s5917_s7, %s4284_s16  ;;  %s5046_s12 = scalar_lea.vmem %s5916_s6, %s4286_s26 }
  0x12   : > { %s4287_s17 = sshll.u32 %s5022_s15, 10  ;;  %s4086_s23 = sshll.u32 %s5022_s15, 3 }
  0x13   : > { %s5052_s21 = scalar_lea.vmem %s5918_s8, %s4287_s17  ;;  %s5058_s3 = scalar_lea.vmem %s5919_s9, %s4086_s23 }
  0x14   : > { %458 = sbr.rel (%p4087_p4) target bundleno = 27 (0x1b), region = 64 }
  0x19   : > { %v459_v0 = vld [vmem:[%s5910_s0] sm:$0xff]  ;;  %vm461_vm0 = vcmask 261120   ;;  %v460_v1 = vld [vmem:[%s5910_s0 + $0x8] sm:$0xff] }
  0x1a   : > { %462 = vst.msk [vmem:[#allocation2] sm:$0xff] %vm461_vm0, %v459_v0  ;;  %463 = vst.msk [vmem:[#allocation2 + $0x8] sm:$0xff] %vm461_vm0, %v460_v1 }
  0x1b PF: > { %v4636_v2 = vld [vmem:[%s427_s22 + $0x8] sm:$0xff]   ;;  %v550_v3 = vlaneseq  ;;  %v4947_v4 = vmov 0.0   ;;  %v4637_v5 = vld [vmem:[%s427_s22] sm:$0xff]   ;;  %vm4948_vm1 = vmmov 0   ;;  %vm501_vm2 = vcmask 261120   ;;  %s4949_s24 = smov 64   ;;  %s5923_s26 = scalar_lea.vmem %s5914_s4, %s5022_s15 }
  0x1c   : > { %4502 = vmatprep.subr.bf16.mxu0 %v4947_v4  ;;  %4510 = vmatprep.subr.bf16.mxu1 %v4947_v4  ;;  %v467_v8 = vld [vmem:[%s5911_s1 + $0x1] sm:$0x1]  ;;  %v468_v11 = vld [vmem:[%s5911_s1 + $0x2] sm:$0x1]  ;;  %v470_v14 = vld [vmem:[%s5911_s1 + $0x4] sm:$0x1] }
  0x1d   : > { %4503 = vmatpush3.bf16.msra.mxu0 %v4636_v2  ;;  %4506 = vmatprep.mubr.msk.bf16.mxu0 %vm4948_vm1, %v4947_v4  ;;  %v5074_v9 = vshrl.u32 %v550_v3, 7  ;;  %v555_v10 = vpack.i.b16 %v467_v8, %v467_v8  ;;  %v562_v13 = vpack.i.b16 %v468_v11, %v468_v11  ;;  %v472_v17 = vld [vmem:[%s5911_s1 + $0x6] sm:$0x1]  ;;  %v576_v19 = vpack.i.b16 %v470_v14, %v470_v14  ;;  %v4088_v24 = vld [vmem:[%s5923_s26] ss:$0 sm:$0xff]  ;;  %s4950_s22 = smov 96  }
  0x1e   : > { %4504 = vmatprep.subr.bf16.mxu0 %v4947_v4  ;;  %4512 = vmatprep.mubr.msk.bf16.mxu1 %vm4948_vm1, %v4947_v4  ;;  %v590_v21 = vpack.i.b16 %v472_v17, %v472_v17  ;;  %v466_v27 = vld [vmem:[%s5911_s1] sm:$0x1]  ;;  %v469_v34 = vld [vmem:[%s5911_s1 + $0x3] sm:$0x1]  ;;  %v471_v39 = vld [vmem:[%s5911_s1 + $0x5] sm:$0x1] }
  0x1f   : > { %v5083_v12 = vsub.s32 0, %v5074_v9  ;;  %v548_v33 = vpack.i.b16 %v466_v27, %v466_v27  ;;  %v569_v37 = vpack.i.b16 %v469_v34, %v469_v34  ;;  %v583_v42 = vpack.i.b16 %v471_v39, %v471_v39  ;;  %v473_v43 = vld [vmem:[%s5911_s1 + $0x7] sm:$0x1]  ;;  %v5203_v3 = vld [vmem:[%s5912_s2 + $0x8] sm:$0xff]  ;;  %p4279_p5 = scmp.ne.s32.totalorder %s5016_s14, 1 }
  0x20   : > { %v597_v45 = vpack.i.b16 %v473_v43, %v473_v43  ;;  %v5192_v60 = vld [vmem:[%s5912_s2] sm:$0xff]  ;;  %vm1009_vm3 = vcmask 130048  }
  0x21   : > { %v464_v6 = vld [vmem:[#allocation2] sm:$0xff]  ;;  %v465_v7 = vld [vmem:[#allocation2 + $0x8] sm:$0xff]  ;;  %4505 = vmatpush3.bf16.msra.mxu0 %v4637_v5  ;;  %v560_v16 = vrot.slane %v555_v10, %v5083_v12  ;;  %v567_v18 = vrot.slane %v562_v13, %v5083_v12  ;;  %v5100_v20 = vrot.slane %v576_v19, %v5083_v12  ;;  %v5105_v22 = vrot.slane %v590_v21, %v5083_v12 }
  0x22   : > { %v481_v15 = vpack.c.bf16 %v465_v7, %v464_v6  ;;  %4516 = vmatprep.subr.bf16.mxu0 %v4947_v4  ;;  %v553_v36 = vrot.slane %v548_v33, %v5083_v12  ;;  %v574_v41 = vrot.slane %v569_v37, %v5083_v12  ;;  %v588_v44 = vrot.slane %v583_v42, %v5083_v12 }
  0x23   : > { %621 = vrot.lane.b32.xlu1 %v560_v16, %s4949_s24  ;;  %v602_v46 = vrot.slane %v597_v45, %v5083_v12 }
  0x24   : > { %4507 = vmatmul.mubr.msk.bf16.vlgmr.msra.gmra.mxu0 %vm501_vm2, %v481_v15 }
  0x25   : > { %4518 = vmatprep.mubr.msk.bf16.mxu0 %vm4948_vm1, %v4947_v4 }
  0x27   : > { %623 = vrot.lane.b32.xlu1 %v567_v18, %s4949_s24 }
  0x2b   : > { %627 = vrot.lane.b32.xlu1 %v5100_v20, %s4949_s24 }
  0x2f   : > { %631 = vrot.lane.b32.xlu1 %v5105_v22, %s4949_s24 }
  0x95   : > { %v622_v30 = vpop.permute.xlu1 %621 }
  0x99   : > { %v624_v38 = vpop.permute.xlu1 %623 }
  0x9d   : > { %v5164_v53 = vpop.permute.xlu1 %627 }
  0xa1   : > { %v5177_v56 = vpop.permute.xlu1 %631 }
  0xe4   : > { %v539_v23 = vpop.f32.mrf.mxu0 }
  0xe5   : > { %v540_v28 = vadd.f32 %v4088_v24, %v539_v23 }
  0xe6   : > { %v4508_v25 = vpop.f32.mrf.mxu0 }
  0xe8   : > { %v542_v26 = vpop.f32.mrf.mxu0 }
  0xe9   : > { %v543_v29 = vadd.f32 %v4088_v24, %v542_v26 }
  0xea   : > { %v4509_v31 = vpop.f32.mrf.mxu0 }
  0xeb   : > { %v5117_v32 = vpack.c.bf16 %v543_v29, %v540_v28 }
  0xed   : > { %652 = vrot.lane.b32.xlu0 %v5117_v32, %s4950_s22  ;;  %v644_v35 = vmul.bf16 %v622_v30, %v5117_v32  ;;  %v645_v40 = vmul.bf16 %v624_v38, %v5117_v32  ;;  %v603_v49 = vmul.bf16 %v553_v36, %v5117_v32  ;;  %v604_v50 = vmul.bf16 %v560_v16, %v5117_v32 }
  0xee   : > { %v606_v51 = vmul.bf16 %v574_v41, %v5117_v32  ;;  %v605_v52 = vmul.bf16 %v567_v18, %v5117_v32  ;;  %v608_v54 = vmul.bf16 %v588_v44, %v5117_v32  ;;  %v607_v55 = vmul.bf16 %v5100_v20, %v5117_v32 }
  0xef   : > { %1243 = vrot.lane.b32.xlu1 %v644_v35, %s4949_s24  ;;  %v610_v57 = vmul.bf16 %v602_v46, %v5117_v32  ;;  %v609_v58 = vmul.bf16 %v5105_v22, %v5117_v32 }
  0xf1   : > { %619 = vrot.lane.b32.xlu0 %v553_v36, %s4949_s24 }
  0xf3   : > { %1291 = vrot.lane.b32.xlu1 %v645_v40, %s4949_s24 }
  0xf5   : > { %625 = vrot.lane.b32.xlu0 %v574_v41, %s4949_s24 }
  0xf9   : > { %629 = vrot.lane.b32.xlu0 %v588_v44, %s4949_s24 }
  0xfd   : > { %633 = vrot.lane.b32.xlu0 %v602_v46, %s4949_s24 }
 0x15f   : > { %v653_v47 = vpop.permute.xlu0 %652 }
 0x160   : > { %v658_v48 = vsel %vm501_vm2, %v653_v47, 0 }
 0x161   : > { %4511 = vmatpush3.bf16.xpose.msra.mxu1 %v658_v48  ;;  %4517 = vmatpush3.bf16.xpose.msra.mxu0 %v658_v48  ;;  %v1244_v59 = vpop.permute.xlu1 %1243 }
 0x162   : > { %4522 = vmatprep.subr.bf16.mxu1 %v4947_v4  ;;  %4528 = vmatprep.subr.bf16.mxu0 %v4947_v4 }
 0x163   : > { %v620_v37 = vpop.permute.xlu0 %619 }
 0x164   : > { %v643_v42 = vmul.bf16 %v620_v37, %v5117_v32 }
 0x168   : > { %4513 = vmatmul.mubr.msk.bf16.vlgmr.msra.gmra.mxu1 %vm501_vm2, %v603_v49  ;;  %4519 = vmatmul.mubr.msk.bf16.vlgmr.msra.gmra.mxu0 %vm501_vm2, %v604_v50 }
 0x169   : > { %4523 = vmatpush3.bf16.xpose.msra.mxu1 %v658_v48  ;;  %4529 = vmatpush3.bf16.xpose.msra.mxu0 %v658_v48 }
 0x16a   : > { %4524 = vmatprep.mubr.msk.bf16.mxu1 %vm4948_vm1, %v4947_v4  ;;  %4530 = vmatprep.mubr.msk.bf16.mxu0 %vm4948_vm1, %v4947_v4 }
 0x16b   : > { %4534 = vmatprep.subr.bf16.mxu1 %v4947_v4  ;;  %4540 = vmatprep.subr.bf16.mxu0 %v4947_v4 }
 0x170   : > { %4525 = vmatmul.mubr.msk.bf16.vlgmr.msra.gmra.mxu1 %vm501_vm2, %v605_v52  ;;  %4531 = vmatmul.mubr.msk.bf16.vlgmr.msra.gmra.mxu0 %vm501_vm2, %v606_v51 }
 0x171   : > { %4535 = vmatpush3.bf16.xpose.msra.mxu1 %v658_v48  ;;  %4541 = vmatpush3.bf16.xpose.msra.mxu0 %v658_v48 }
 0x172   : > { %4536 = vmatprep.mubr.msk.bf16.mxu1 %vm4948_vm1, %v4947_v4  ;;  %4542 = vmatprep.mubr.msk.bf16.mxu0 %vm4948_vm1, %v4947_v4 }
 0x173   : > { %4546 = vmatprep.subr.bf16.mxu1 %v4947_v4  ;;  %4552 = vmatprep.subr.bf16.mxu0 %v4947_v4 }
 0x178   : > { %4537 = vmatmul.mubr.msk.bf16.vlgmr.msra.gmra.mxu1 %vm501_vm2, %v607_v55  ;;  %4543 = vmatmul.mubr.msk.bf16.vlgmr.msra.gmra.mxu0 %vm501_vm2, %v608_v54 }
 0x179   : > { %4547 = vmatpush3.bf16.xpose.msra.mxu1 %v658_v48  ;;  %4553 = vmatpush3.bf16.xpose.msra.mxu0 %v658_v48 }
 0x17a   : > { %4548 = vmatprep.mubr.msk.bf16.mxu1 %vm4948_vm1, %v4947_v4  ;;  %4554 = vmatprep.mubr.msk.bf16.mxu0 %vm4948_vm1, %v4947_v4 }
 0x17b   : > { %4564 = vmatprep.subr.bf16.mxu0 %v4947_v4  ;;  %4558 = vmatprep.subr.bf16.mxu1 %v4947_v4 }
 0x180   : > { %4549 = vmatmul.mubr.msk.bf16.vlgmr.msra.gmra.mxu1 %vm501_vm2, %v609_v58  ;;  %4555 = vmatmul.mubr.msk.bf16.vlgmr.msra.gmra.mxu0 %vm501_vm2, %v610_v57 }
 0x181   : > { %4565 = vmatpush3.bf16.msra.mxu0 %v1244_v59  ;;  %4560 = vmatprep.mubr.msk.bf16.mxu1 %vm4948_vm1, %v4947_v4 }
 0x182   : > { %4566 = vmatprep.mubr.msk.bf16.mxu0 %vm4948_vm1, %v4947_v4  ;;  %4576 = vmatprep.subr.bf16.mxu0 %v4947_v4 }
 0x228   : > { %v694_v61 = vpop.f32.mrf.mxu1  ;;  %v738_v62 = vpop.f32.mrf.mxu0 }
 0x229   : > { %v5195_v63 = vadd.f32 %v694_v61, %v5192_v60  ;;  %v5198_v0 = vadd.f32 %v738_v62, %v5192_v60 }
 0x22a   : > { %v4514_v1 = vpop.f32.mrf.mxu1  ;;  %v4520_v2 = vpop.f32.mrf.mxu0 }
 0x22b   : > { %v1010_v5 = vsel %vm1009_vm3, %v5195_v63, -inf  ;;  %v1016_v6 = vsel %vm1009_vm3, %v5198_v0, -inf }
 0x22c   : > { %1011 = vmax.xlane.f32.xlu0 %v1010_v5  ;;  %v697_v7 = vpop.f32.mrf.mxu1  ;;  %1017 = vmax.xlane.f32.xlu1 %v1016_v6  ;;  %v741_v8 = vpop.f32.mrf.mxu0 }
 0x22d   : > { %v5210_v10 = vadd.f32 %v697_v7, %v5203_v3  ;;  %v5213_v14 = vadd.f32 %v741_v8, %v5203_v3 }
 0x22e   : > { %v4515_v11 = vpop.f32.mrf.mxu1  ;;  %v4521_v13 = vpop.f32.mrf.mxu0 }
 0x22f   : > { %v1013_v15 = vsel %vm1009_vm3, %v5210_v10, -inf  ;;  %v1019_v21 = vsel %vm1009_vm3, %v5213_v14, -inf  ;;  %v647_v11 = vmul.bf16 %v5164_v53, %v5117_v32 }
 0x230   : > { %v782_v16 = vpop.f32.mrf.mxu1  ;;  %1014 = vmax.xlane.f32.xlu1 %v1013_v15  ;;  %v826_v17 = vpop.f32.mrf.mxu0 }
 0x231   : > { %v5218_v20 = vadd.f32 %v782_v16, %v5192_v60  ;;  %v5223_v26 = vadd.f32 %v826_v17, %v5192_v60  ;;  %v626_v15 = vpop.permute.xlu0 %625 }
 0x232   : > { %v4526_v18 = vpop.f32.mrf.mxu1  ;;  %v4532_v19 = vpop.f32.mrf.mxu0  ;;  %v646_v16 = vmul.bf16 %v626_v15, %v5117_v32 }
 0x233   : > { %v1022_v27 = vsel %vm1009_vm3, %v5218_v20, -inf  ;;  %v1028_v34 = vsel %vm1009_vm3, %v5223_v26, -inf  ;;  %v5288_v18 = vpop.permute.xlu1 %1291 }
 0x234   : > { %v785_v22 = vpop.f32.mrf.mxu1  ;;  %1020 = vmax.xlane.f32.xlu1 %v1019_v21  ;;  %v829_v23 = vpop.f32.mrf.mxu0 }
 0x235   : > { %v5228_v33 = vadd.f32 %v785_v22, %v5203_v3  ;;  %v5233_v40 = vadd.f32 %v829_v23, %v5203_v3  ;;  %v630_v17 = vpop.permute.xlu0 %629 }
 0x236   : > { %v4527_v24 = vpop.f32.mrf.mxu1  ;;  %v4533_v25 = vpop.f32.mrf.mxu0 }
 0x237   : > { %v1025_v41 = vsel %vm1009_vm3, %v5228_v33, -inf  ;;  %v1031_v48 = vsel %vm1009_vm3, %v5233_v40, -inf }
 0x238   : > { %v870_v28 = vpop.f32.mrf.mxu1  ;;  %1023 = vmax.xlane.f32.xlu1 %v1022_v27  ;;  %v914_v29 = vpop.f32.mrf.mxu0 }
 0x239   : > { %v5240_v47 = vadd.f32 %v870_v28, %v5192_v60  ;;  %v5267_v5 = vadd.f32 %v914_v29, %v5192_v60  ;;  %v5290_v19 = vpop.permute.xlu0 %633 }
 0x23a   : > { %v4538_v30 = vpop.f32.mrf.mxu1  ;;  %v4544_v31 = vpop.f32.mrf.mxu0 }
 0x23b   : > { %v1034_v55 = vsel %vm1009_vm3, %v5240_v47, -inf  ;;  %v1040_v7 = vsel %vm1009_vm3, %v5267_v5, -inf }
 0x23c   : > { %v873_v35 = vpop.f32.mrf.mxu1  ;;  %1029 = vmax.xlane.f32.xlu1 %v1028_v34  ;;  %v917_v36 = vpop.f32.mrf.mxu0 }
 0x23d   : > { %v5245_v54 = vadd.f32 %v873_v35, %v5203_v3  ;;  %v5250_v57 = vadd.f32 %v917_v36, %v5203_v3 }
 0x23e   : > { %v4539_v38 = vpop.f32.mrf.mxu1  ;;  %v4545_v39 = vpop.f32.mrf.mxu0 }
 0x23f   : > { %v1037_v58 = vsel %vm1009_vm3, %v5245_v54, -inf  ;;  %v1043_v61 = vsel %vm1009_vm3, %v5250_v57, -inf }
 0x240   : > { %v958_v43 = vpop.f32.mrf.mxu1  ;;  %1026 = vmax.xlane.f32.xlu1 %v1025_v41  ;;  %v1002_v44 = vpop.f32.mrf.mxu0 }
 0x241   : > { %v5270_v6 = vadd.f32 %v958_v43, %v5192_v60 }
 0x242   : > { %1195 = vrot.lane.b32.xlu0 %v643_v42, %s4949_s24  ;;  %v4550_v45 = vpop.f32.mrf.mxu1  ;;  %v4556_v46 = vpop.f32.mrf.mxu0 }
 0x243   : > { %v1046_v8 = vsel %vm1009_vm3, %v5270_v6, -inf }
 0x244   : > { %v961_v49 = vpop.f32.mrf.mxu1  ;;  %1032 = vmax.xlane.f32.xlu1 %v1031_v48  ;;  %v1005_v50 = vpop.f32.mrf.mxu0 }
 0x245   : > { %v5255_v59 = vadd.f32 %v961_v49, %v5203_v3  ;;  %v5260_v62 = vadd.f32 %v1005_v50, %v5203_v3  ;;  %v5275_v3 = vadd.f32 %v1002_v44, %v5192_v60  ;;  %v648_v60 = vmul.bf16 %v630_v17, %v5117_v32 }
 0x246   : > { %v4551_v51 = vpop.f32.mrf.mxu1  ;;  %v4557_v52 = vpop.f32.mrf.mxu0 }
 0x247   : > { %v1049_v1 = vsel %vm1009_vm3, %v5255_v59, -inf  ;;  %v1055_v2 = vsel %vm1009_vm3, %v5260_v62, -inf  ;;  %v1052_v13 = vsel %vm1009_vm3, %v5275_v3, -inf }
 0x248   : > { %1035 = vmax.xlane.f32.xlu1 %v1034_v55 }
 0x24c   : > { %1038 = vmax.xlane.f32.xlu1 %v1037_v58 }
 0x250   : > { %1044 = vmax.xlane.f32.xlu1 %v1043_v61 }
 0x254   : > { %1050 = vmax.xlane.f32.xlu1 %v1049_v1 }
 0x258   : > { %1056 = vmax.xlane.f32.xlu1 %v1055_v2 }
 0x261   : > { %1041 = vmax.xlane.f32.xlu0 %v1040_v7 }
 0x265   : > { %1047 = vmax.xlane.f32.xlu0 %v1046_v8 }
 0x269   : > { %1053 = vmax.xlane.f32.xlu0 %v1052_v13  ;;  %1387 = vrot.lane.b32.xlu1 %v647_v11, %s4949_s24 }
 0x27f   : > { %1339 = vrot.lane.b32.xlu0 %v646_v16, %s4949_s24 }
 0x283   : > { %1435 = vrot.lane.b32.xlu0 %v648_v60, %s4949_s24 }
 0x2b5   : > { %v1012_v53 = vpop.xlane.xlu0 %1011  ;;  %v1018_v21 = vpop.xlane.xlu1 %1017 }
 0x2b6   : > { %v1058_v22 = vsub.f32 %v5195_v63, %v1012_v53  ;;  %v1060_v23 = vsub.f32 %v5198_v0, %v1018_v21 }
 0x2b8   : > { %v1074_v24 = vmul.f32 1.442695, %v1058_v22  ;;  %v1078_v25 = vmul.f32 1.442695, %v1060_v23 }
 0x2b9   : > { %v1196_v27 = vpop.permute.xlu0 %1195  ;;  %v1015_v28 = vpop.xlane.xlu1 %1014 }
 0x2ba   : > { %4768 = vpow2.f32 %v1074_v24  ;;  %v1059_v29 = vsub.f32 %v5210_v10, %v1015_v28  ;;  %4559 = vmatpush3.bf16.msra.mxu1 %v1196_v27 }
 0x2bb   : > { %4770 = vpow2.f32 %v1078_v25  ;;  %4570 = vmatprep.subr.bf16.mxu1 %v4947_v4 }
 0x2bc   : > { %v1076_v30 = vmul.f32 1.442695, %v1059_v29 }
 0x2bd   : > { %v1021_v31 = vpop.xlane.xlu1 %1020 }
 0x2be   : > { %4772 = vpow2.f32 %v1076_v30  ;;  %v1061_v34 = vsub.f32 %v5213_v14, %v1021_v31 }
 0x2c0   : > { %v1080_v35 = vmul.f32 1.442695, %v1061_v34 }
 0x2c1   : > { %v1024_v63 = vpop.xlane.xlu1 %1023 }
 0x2c2   : > { %4774 = vpow2.f32 %v1080_v35  ;;  %v1062_v0 = vsub.f32 %v5218_v20, %v1024_v63 }
 0x2c4   : > { %v1082_v36 = vmul.f32 1.442695, %v1062_v0 }
 0x2c5   : > { %v1030_v37 = vpop.xlane.xlu1 %1029 }
 0x2c6   : > { %4776 = vpow2.f32 %v1082_v36  ;;  %v1064_v38 = vsub.f32 %v5223_v26, %v1030_v37 }
 0x2c7   : > { %v5299_v10 = vpop.eup %4768 }
 0x2c8   : > { %v5301_v39 = vpop.eup %4770  ;;  %v1086_v41 = vmul.f32 1.442695, %v1064_v38  ;;  %v1106_v42 = vsel %vm1009_vm3, %v5299_v10, 0.0 }
 0x2c9   : > { %v1027_v43 = vpop.xlane.xlu1 %1026  ;;  %v1112_v14 = vsel %vm1009_vm3, %v5301_v39, 0.0  ;;  %1107 = vadd.xlane.f32.xlu1 %v1106_v42 }
 0x2ca   : > { %4778 = vpow2.f32 %v1086_v41  ;;  %v1063_v20 = vsub.f32 %v5228_v33, %v1027_v43  ;;  %1113 = vadd.xlane.f32.xlu0 %v1112_v14 }
 0x2cb   : > { %v5308_v44 = vpop.eup %4772 }
 0x2cc   : > { %v1084_v26 = vmul.f32 1.442695, %v1063_v20  ;;  %v1109_v45 = vsel %vm1009_vm3, %v5308_v44, 0.0 }
 0x2cd   : > { %v1033_v46 = vpop.xlane.xlu1 %1032 }
 0x2ce   : > { %4780 = vpow2.f32 %v1084_v26  ;;  %v1065_v48 = vsub.f32 %v5233_v40, %v1033_v46  ;;  %1110 = vadd.xlane.f32.xlu0 %v1109_v45  ;;  %v650_v46 = vmul.bf16 %v5290_v19, %v5117_v32 }
 0x2cf   : > { %v5313_v49 = vpop.eup %4774 }
 0x2d0   : > { %v1088_v50 = vmul.f32 1.442695, %v1065_v48  ;;  %v1115_v51 = vsel %vm1009_vm3, %v5313_v49, 0.0 }
 0x2d1   : > { %v1036_v52 = vpop.xlane.xlu1 %1035  ;;  %1116 = vadd.xlane.f32.xlu1 %v1115_v51 }
 0x2d2   : > { %4782 = vpow2.f32 %v1088_v50  ;;  %v1066_v33 = vsub.f32 %v5240_v47, %v1036_v52 }
 0x2d3   : > { %v5318_v55 = vpop.eup %4776 }
 0x2d4   : > { %v1090_v58 = vmul.f32 1.442695, %v1066_v33  ;;  %v1118_v61 = vsel %vm1009_vm3, %v5318_v55, 0.0 }
 0x2d5   : > { %v1039_v1 = vpop.xlane.xlu1 %1038  ;;  %1119 = vadd.xlane.f32.xlu0 %v1118_v61 }
 0x2d6   : > { %4784 = vpow2.f32 %v1090_v58  ;;  %v1067_v40 = vsub.f32 %v5245_v54, %v1039_v1 }
 0x2d7   : > { %v5323_v2 = vpop.eup %4778 }
 0x2d8   : > { %v1092_v7 = vmul.f32 1.442695, %v1067_v40  ;;  %v1124_v8 = vsel %vm1009_vm3, %v5323_v2, 0.0 }
 0x2d9   : > { %v1045_v11 = vpop.xlane.xlu1 %1044  ;;  %1125 = vadd.xlane.f32.xlu0 %v1124_v8 }
 0x2da   : > { %4786 = vpow2.f32 %v1092_v7  ;;  %v1069_v47 = vsub.f32 %v5250_v57, %v1045_v11 }
 0x2db   : > { %v5328_v13 = vpop.eup %4780 }
 0x2dc   : > { %v1096_v15 = vmul.f32 1.442695, %v1069_v47  ;;  %v1121_v16 = vsel %vm1009_vm3, %v5328_v13, 0.0 }
 0x2dd   : > { %v1051_v17 = vpop.xlane.xlu1 %1050  ;;  %1122 = vadd.xlane.f32.xlu1 %v1121_v16 }
 0x2de   : > { %4788 = vpow2.f32 %v1096_v15  ;;  %v1071_v54 = vsub.f32 %v5255_v59, %v1051_v17 }
 0x2df   : > { %v5333_v60 = vpop.eup %4782 }
 0x2e0   : > { %v1100_v53 = vmul.f32 1.442695, %v1071_v54  ;;  %v1127_v21 = vsel %vm1009_vm3, %v5333_v60, 0.0 }
 0x2e1   : > { %1128 = vadd.xlane.f32.xlu1 %v1127_v21  ;;  %v1057_v22 = vpop.xlane.xlu1 %1056 }
 0x2e2   : > { %4790 = vpow2.f32 %v1100_v53  ;;  %v1073_v57 = vsub.f32 %v5260_v62, %v1057_v22 }
 0x2e3   : > { %v5338_v23 = vpop.eup %4784 }
 0x2e4   : > { %v1104_v24 = vmul.f32 1.442695, %v1073_v57  ;;  %v1130_v25 = vsel %vm1009_vm3, %v5338_v23, 0.0 }
 0x2e5   : > { %1131 = vadd.xlane.f32.xlu0 %v1130_v25  ;;  %v1388_v50 = vpop.permute.xlu1 %1387 }
 0x2e6   : > { %4792 = vpow2.f32 %v1104_v24 }
 0x2e7   : > { %v5342_v59 = vpop.eup %4786 }
 0x2e8   : > { %v1133_v27 = vsel %vm1009_vm3, %v5342_v59, 0.0 }
 0x2e9   : > { %1134 = vadd.xlane.f32.xlu1 %v1133_v27 }
 0x2ea   : > { %v1042_v28 = vpop.xlane.xlu0 %1041 }
 0x2eb   : > { %v5346_v29 = vpop.eup %4788  ;;  %v1068_v30 = vsub.f32 %v5267_v5, %v1042_v28 }
 0x2ec   : > { %v1139_v62 = vsel %vm1009_vm3, %v5346_v29, 0.0 }
 0x2ed   : > { %v1094_v31 = vmul.f32 1.442695, %v1068_v30  ;;  %1140 = vadd.xlane.f32.xlu1 %v1139_v62 }
 0x2ee   : > { %v1048_v34 = vpop.xlane.xlu0 %1047 }
 0x2ef   : > { %v5351_v35 = vpop.eup %4790  ;;  %4794 = vpow2.f32 %v1094_v31  ;;  %v1070_v63 = vsub.f32 %v5270_v6, %v1048_v34 }
 0x2f0   : > { %v1145_v0 = vsel %vm1009_vm3, %v5351_v35, 0.0 }
 0x2f1   : > { %v1098_v36 = vmul.f32 1.442695, %v1070_v63  ;;  %1146 = vadd.xlane.f32.xlu1 %v1145_v0 }
 0x2f2   : > { %v1054_v37 = vpop.xlane.xlu0 %1053 }
 0x2f3   : > { %v5356_v38 = vpop.eup %4792  ;;  %4796 = vpow2.f32 %v1098_v36  ;;  %v1072_v5 = vsub.f32 %v5275_v3, %v1054_v37  ;;  %v649_v3 = vmul.bf16 %v5177_v56, %v5117_v32 }
 0x2f4   : > { %v1151_v41 = vsel %vm1009_vm3, %v5356_v38, 0.0 }
 0x2f5   : > { %v1102_v42 = vmul.f32 1.442695, %v1072_v5  ;;  %1152 = vadd.xlane.f32.xlu1 %v1151_v41 }
 0x2f6   : > { %v1340_v48 = vpop.permute.xlu0 %1339 }
 0x2f7   : > { %4798 = vpow2.f32 %v1102_v42 }
 0x2fa   : > { %v1436_v51 = vpop.permute.xlu0 %1435 }
 0x2fc   : > { %v5361_v43 = vpop.eup %4794 }
 0x2fd   : > { %v1136_v6 = vsel %vm1009_vm3, %v5361_v43, 0.0 }
 0x2fe   : > { %1137 = vadd.xlane.f32.xlu0 %v1136_v6 }
 0x300   : > { %v5365_v14 = vpop.eup %4796 }
 0x301   : > { %v1142_v20 = vsel %vm1009_vm3, %v5365_v14, 0.0 }
 0x302   : > { %1143 = vadd.xlane.f32.xlu0 %v1142_v20 }
 0x304   : > { %v5369_v26 = vpop.eup %4798 }
 0x305   : > { %v1148_v45 = vsel %vm1009_vm3, %v5369_v26, 0.0 }
 0x306   : > { %1149 = vadd.xlane.f32.xlu0 %v1148_v45  ;;  %1483 = vrot.lane.b32.xlu1 %v649_v3, %s4949_s24 }
 0x31c   : > { %1531 = vrot.lane.b32.xlu0 %v650_v46, %s4949_s24 }
 0x352   : > { %v1108_v33 = vpop.xlane.xlu1 %1107 }
 0x353   : > { %v1114_v52 = vpop.xlane.xlu0 %1113  ;;  %4800 = vrcp.f32 %v1108_v33 }
 0x357   : > { %v1111_v58 = vpop.xlane.xlu0 %1110 }
 0x358   : > { %4802 = vrcp.f32 %v1111_v58 }
 0x359   : > { %4804 = vrcp.f32 %v1114_v52  ;;  %v4639_v52 = vld [vmem:[%s5035_s25] sm:$0xff]  }
 0x35a   : > { %v1117_v56 = vpop.xlane.xlu1 %1116 }
 0x35b   : > { %4806 = vrcp.f32 %v1117_v56 }
 0x35e   : > { %v1120_v61 = vpop.xlane.xlu0 %1119 }
 0x35f   : > { %4808 = vrcp.f32 %v1120_v61 }
 0x360   : > { %v4801_v1 = vpop.eup %4800 }
 0x361   : > { %v1155_v19 = vmul.f32 %v4801_v1, %v5299_v10 }
 0x362   : > { %v1126_v8 = vpop.xlane.xlu0 %1125 }
 0x365   : > { %v4803_v40 = vpop.eup %4802 }
 0x366   : > { %v4805_v7 = vpop.eup %4804  ;;  %v1123_v32 = vpop.xlane.xlu1 %1122  ;;  %v1157_v11 = vmul.f32 %v4803_v40, %v5308_v44 }
 0x367   : > { %4810 = vrcp.f32 %v1123_v32  ;;  %v1159_v16 = vmul.f32 %v4805_v7, %v5301_v39 }
 0x368   : > { %v4807_v47 = vpop.eup %4806  ;;  %v1186_v15 = vpack.c.bf16 %v1157_v11, %v1155_v19  ;;  %4812 = vrcp.f32 %v1126_v8 }
 0x369   : > { %v1161_v17 = vmul.f32 %v4807_v47, %v5313_v49 }
 0x36a   : > { %4561 = vmatmul.mubr.msk.bf16.vlgmr.msra.gmra.mxu1 %vm1009_vm3, %v1186_v15  ;;  %v1129_v54 = vpop.xlane.xlu1 %1128 }
 0x36b   : > { %4571 = vmatpush3.bf16.msra.mxu1 %v5288_v18  ;;  %4814 = vrcp.f32 %v1129_v54  ;;  %v1187_v53 = vpack.c.bf16 %v1161_v17, %v1159_v16  ;;  %4572 = vmatprep.mubr.msk.bf16.mxu1 %vm4948_vm1, %v4947_v4 }
 0x36c   : > { %4582 = vmatprep.subr.bf16.mxu1 %v4947_v4  ;;  %v4809_v39 = vpop.eup %4808 }
 0x36d   : > { %4567 = vmatmul.mubr.msk.bf16.vlgmr.msra.gmra.mxu0 %vm1009_vm3, %v1187_v53  ;;  %v1163_v49 = vmul.f32 %v4809_v39, %v5318_v55 }
 0x36e   : > { %4577 = vmatpush3.bf16.msra.mxu0 %v1340_v48  ;;  %v1132_v10 = vpop.xlane.xlu0 %1131  ;;  %4578 = vmatprep.mubr.msk.bf16.mxu0 %vm4948_vm1, %v4947_v4 }
 0x36f   : > { %4588 = vmatprep.subr.bf16.mxu0 %v4947_v4  ;;  %4816 = vrcp.f32 %v1132_v10 }
 0x372   : > { %v1135_v44 = vpop.xlane.xlu1 %1134 }
 0x373   : > { %4818 = vrcp.f32 %v1135_v44 }
 0x374   : > { %v4811_v18 = vpop.eup %4810 }
 0x375   : > { %v1165_v21 = vmul.f32 %v4811_v18, %v5328_v13  ;;  %v4813_v22 = vpop.eup %4812 }
 0x376   : > { %v1141_v57 = vpop.xlane.xlu1 %1140  ;;  %v1167_v27 = vmul.f32 %v4813_v22, %v5323_v2 }
 0x377   : > { %v1188_v24 = vpack.c.bf16 %v1165_v21, %v1163_v49  ;;  %4820 = vrcp.f32 %v1141_v57 }
 0x378   : > { %v4815_v25 = vpop.eup %4814 }
 0x379   : > { %4573 = vmatmul.mubr.msk.bf16.vlgmr.msra.gmra.mxu1 %vm1009_vm3, %v1188_v24  ;;  %v1169_v28 = vmul.f32 %v4815_v25, %v5333_v60 }
 0x37a   : > { %4583 = vmatpush3.bf16.msra.mxu1 %v1388_v50  ;;  %v1147_v30 = vpop.xlane.xlu1 %1146  ;;  %4584 = vmatprep.mubr.msk.bf16.mxu1 %vm4948_vm1, %v4947_v4 }
 0x37b   : > { %v1189_v62 = vpack.c.bf16 %v1169_v28, %v1167_v27  ;;  %4594 = vmatprep.subr.bf16.mxu1 %v4947_v4 }
 0x37c   : > { %v4817_v55 = vpop.eup %4816 }
 0x37d   : > { %4579 = vmatmul.mubr.msk.bf16.vlgmr.msra.gmra.mxu0 %vm1009_vm3, %v1189_v62  ;;  %v1171_v60 = vmul.f32 %v4817_v55, %v5338_v23 }
 0x37e   : > { %4589 = vmatpush3.bf16.msra.mxu0 %v1436_v51  ;;  %4590 = vmatprep.mubr.msk.bf16.mxu0 %vm4948_vm1, %v4947_v4  ;;  %v1153_v13 = vpop.xlane.xlu1 %1152 }
 0x37f   : > { %4600 = vmatprep.subr.bf16.mxu0 %v4947_v4 }
 0x380   : > { %v4819_v2 = vpop.eup %4818 }
 0x381   : > { %v1173_v31 = vmul.f32 %v4819_v2, %v5342_v59 }
 0x382   : > { %v1484_v63 = vpop.permute.xlu1 %1483 }
 0x383   : > { %v1190_v34 = vpack.c.bf16 %v1173_v31, %v1171_v60 }
 0x384   : > { %v4821_v59 = vpop.eup %4820 }
 0x385   : > { %4585 = vmatmul.mubr.msk.bf16.vlgmr.msra.gmra.mxu1 %vm1009_vm3, %v1190_v34  ;;  %v1177_v41 = vmul.f32 %v4821_v59, %v5346_v29 }
 0x386   : > { %4595 = vmatpush3.bf16.msra.mxu1 %v1484_v63  ;;  %4596 = vmatprep.mubr.msk.bf16.mxu1 %vm4948_vm1, %v4947_v4 }
 0x387   : > { %v1138_v0 = vpop.xlane.xlu0 %1137  ;;  %4606 = vmatprep.subr.bf16.mxu1 %v4947_v4 }
 0x388   : > { %4822 = vrcp.f32 %v1138_v0 }
 0x389   : > { %4824 = vrcp.f32 %v1147_v30 }
 0x38b   : > { %v1144_v36 = vpop.xlane.xlu0 %1143 }
 0x38c   : > { %4826 = vrcp.f32 %v1144_v36 }
 0x38d   : > { %4828 = vrcp.f32 %v1153_v13 }
 0x38f   : > { %v1150_v23 = vpop.xlane.xlu0 %1149 }
 0x390   : > { %4830 = vrcp.f32 %v1150_v23 }
 0x393   : > { %v1532_v3 = vpop.permute.xlu0 %1531 }
 0x395   : > { %v4823_v37 = vpop.eup %4822 }
 0x396   : > { %v1175_v5 = vmul.f32 %v4823_v37, %v5361_v43  ;;  %v4825_v42 = vpop.eup %4824 }
 0x397   : > { %v1181_v46 = vmul.f32 %v4825_v42, %v5351_v35  ;;  %v4638_v35 = vld [vmem:[%s5035_s25 + $0x8] sm:$0xff]  }
 0x398   : > { %v1191_v6 = vpack.c.bf16 %v1177_v41, %v1175_v5 }
 0x399   : > { %v4827_v20 = vpop.eup %4826 }
 0x39a   : > { %4591 = vmatmul.mubr.msk.bf16.vlgmr.msra.gmra.mxu0 %vm1009_vm3, %v1191_v6  ;;  %v1179_v45 = vmul.f32 %v4827_v20, %v5365_v14  ;;  %v4829_v48 = vpop.eup %4828 }
 0x39b   : > { %4601 = vmatpush3.bf16.msra.mxu0 %v1532_v3  ;;  %4602 = vmatprep.mubr.msk.bf16.mxu0 %vm4948_vm1, %v4947_v4  ;;  %v1185_v51 = vmul.f32 %v4829_v48, %v5356_v38 }
 0x39c   : > { %v1192_v43 = vpack.c.bf16 %v1181_v46, %v1179_v45 }
 0x39d   : > { %v4831_v50 = vpop.eup %4830 }
 0x39e   : > { %4597 = vmatmul.mubr.msk.bf16.vlgmr.msra.gmra.mxu1 %vm1009_vm3, %v1192_v43  ;;  %v1183_v29 = vmul.f32 %v4831_v50, %v5369_v26 }
 0x39f   : > { %4610 = vmatprep.mubr.msk.bf16.mxu1 %vm4948_vm1, %v4947_v4  ;;  %4607 = vmatpush3.bf16.msra.mxu1 %v4638_v35 }
 0x3a0   : > { %v1193_v14 = vpack.c.bf16 %v1185_v51, %v1183_v29  ;;  %4608 = vmatprep.subr.bf16.mxu1 %v4947_v4 }
 0x3a2   : > { %4603 = vmatmul.mubr.msk.bf16.vlgmr.msra.gmra.mxu0 %vm1009_vm3, %v1193_v14 }
 0x3a3   : > { %4609 = vmatpush3.bf16.msra.mxu1 %v4639_v52 }
 0x42a   : > { %v1235_v33 = vpop.f32.mrf.mxu1 }
 0x42b   : > { %v1578_v18 = vsel %vm501_vm2, %v1235_v33, 0.0 }
 0x42c   : > { %v4562_v58 = vpop.f32.mrf.mxu1 }
 0x42d   : > { %v1283_v56 = vpop.f32.mrf.mxu0  ;;  %v5444_v58 = vld [vmem:[%s5058_s3] sm:$0xff] }
 0x42e   : > { %v1238_v61 = vpop.f32.mrf.mxu1  ;;  %v1579_v10 = vsel %vm501_vm2, %v1283_v56, 0.0  ;;  %v1616_v56 = vrot.slane %v5444_v58, %v5083_v12 }
 0x42f   : > { %v4568_v1 = vpop.f32.mrf.mxu0  ;;  %v1593_v49 = vsel %vm501_vm2, %v1238_v61, 0.0  ;;  %v1580_v57 = vadd.f32 %v1579_v10, %v1578_v18 }
 0x430   : > { %v4563_v26 = vpop.f32.mrf.mxu1 }
 0x431   : > { %v1286_v40 = vpop.f32.mrf.mxu0 }
 0x432   : > { %v1594_v39 = vsel %vm501_vm2, %v1286_v40, 0.0  ;;  %v4904_v40 = vld [vmem:[#allocation2] sm:$0xff] }
 0x433   : > { %v4569_v38 = vpop.f32.mrf.mxu0  ;;  %v1595_v24 = vadd.f32 %v1594_v39, %v1593_v49 }
 0x439   : > { %v1331_v7 = vpop.f32.mrf.mxu1 }
 0x43a   : > { %v1581_v21 = vsel %vm501_vm2, %v1331_v7, 0.0 }
 0x43b   : > { %v4574_v8 = vpop.f32.mrf.mxu1  ;;  %v1582_v30 = vadd.f32 %v1581_v21, %v1580_v57  ;;  %v1730_v21 = vld [vmem:[%s5046_s12 + $0x80] sm:$0xff]  ;;  %v1731_v57 = vld [vmem:[%s5046_s12 + $0x88] sm:$0xff] }
 0x43d   : > { %v1334_v32 = vpop.f32.mrf.mxu1  ;;  %v1379_v19 = vpop.f32.mrf.mxu0 }
 0x43e   : > { %v1596_v22 = vsel %vm501_vm2, %v1334_v32, 0.0  ;;  %v1583_v27 = vsel %vm501_vm2, %v1379_v19, 0.0 }
 0x43f   : > { %v4575_v11 = vpop.f32.mrf.mxu1  ;;  %v4580_v47 = vpop.f32.mrf.mxu0  ;;  %v1597_v62 = vadd.f32 %v1596_v22, %v1595_v24  ;;  %v1584_v31 = vadd.f32 %v1583_v27, %v1582_v30  ;;  %v1738_v22 = vld [vmem:[%s5046_s12 + $0xc0] sm:$0xff] }
 0x440   : > { %v4905_v11 = vld [vmem:[#allocation2 + $0x8] sm:$0xff]  ;;  %v4128_v24 = vcombine.high %v1730_v21, %v1738_v22  ;;  %v4127_v27 = vcombine.low %v1730_v21, %v1738_v22 }
 0x441   : > { %v1382_v15 = vpop.f32.mrf.mxu0  ;;  %v1727_v21 = vld [vmem:[%s5046_s12 + $0x68] sm:$0xff] }
 0x442   : > { %v1598_v28 = vsel %vm501_vm2, %v1382_v15, 0.0  ;;  %2006 = vmatprep.subr.bf16.mxu0 %v4128_v24 }
 0x443   : > { %v4581_v16 = vpop.f32.mrf.mxu0  ;;  %v1599_v34 = vadd.f32 %v1598_v28, %v1597_v62  ;;  %2007 = vmatpush1.bf16.msra.mxu0 %v4127_v27  ;;  %v1714_v62 = vld [vmem:[%s5046_s12] sm:$0xff]  ;;  %v1736_v27 = vld [vmem:[%s5046_s12 + $0xb0] sm:$0xff] }
 0x445   : > { %v1427_v17 = vpop.f32.mrf.mxu1 }
 0x446   : > { %v1585_v2 = vsel %vm501_vm2, %v1427_v17, 0.0 }
 0x447   : > { %v4586_v4 = vpop.f32.mrf.mxu1  ;;  %v1586_v59 = vadd.f32 %v1585_v2, %v1584_v31 }
 0x449   : > { %v1430_v54 = vpop.f32.mrf.mxu1 }
 0x44a   : > { %v1600_v60 = vsel %vm501_vm2, %v1430_v54, 0.0 }
 0x44b   : > { %v4587_v53 = vpop.f32.mrf.mxu1  ;;  %v1601_v37 = vadd.f32 %v1600_v60, %v1599_v34  ;;  %v1723_v60 = vld [vmem:[%s5046_s12 + $0x48] sm:$0xff] }
 0x45a   : > { %v1475_v44 = vpop.f32.mrf.mxu0 }
 0x45b   : > { %v1587_v36 = vsel %vm501_vm2, %v1475_v44, 0.0 }
 0x45c   : > { %v4592_v25 = vpop.f32.mrf.mxu0  ;;  %v1588_v20 = vadd.f32 %v1587_v36, %v1586_v59  ;;  %v1740_v36 = vld [vmem:[%s5046_s12 + $0xd0] sm:$0xff]  ;;  %v4951_v59 = vmov 0  }
 0x45d   : > { %v1739_v25 = vld [vmem:[%s5046_s12 + $0xc8] sm:$0xff]  ;;  %2026 = vmatprep.mubr.bf16.mxu0 %v4951_v59 }
 0x45e   : > { %v1478_v55 = vpop.f32.mrf.mxu0  ;;  %v1523_v13 = vpop.f32.mrf.mxu1  ;;  %v4129_v28 = vcombine.low %v1731_v57, %v1739_v25  ;;  %v4130_v30 = vcombine.high %v1731_v57, %v1739_v25 }
 0x45f   : > { %v1602_v23 = vsel %vm501_vm2, %v1478_v55, 0.0  ;;  %v1589_v42 = vsel %vm501_vm2, %v1523_v13, 0.0  ;;  %v1722_v55 = vld [vmem:[%s5046_s12 + $0x40] sm:$0xff]  ;;  %v1715_v13 = vld [vmem:[%s5046_s12 + $0x8] sm:$0xff] }
 0x460   : > { %v4593_v63 = vpop.f32.mrf.mxu0  ;;  %v4598_v0 = vpop.f32.mrf.mxu1  ;;  %v1603_v3 = vadd.f32 %v1602_v23, %v1601_v37  ;;  %v1590_v43 = vadd.f32 %v1589_v42, %v1588_v20  ;;  %2049 = vmatprep.subr.bf16.mxu1 %v4130_v30  ;;  %v4112_v2 = vcombine.high %v1714_v62, %v1722_v55  ;;  %v4111_v31 = vcombine.low %v1714_v62, %v1722_v55  ;;  %v1733_v23 = vld [vmem:[%s5046_s12 + $0x98] sm:$0xff] }
 0x461   : > { %v4113_v34 = vcombine.low %v1715_v13, %v1723_v60  ;;  %v4114_v63 = vcombine.high %v1715_v13, %v1723_v60  ;;  %v1732_v0 = vld [vmem:[%s5046_s12 + $0x90] sm:$0xff]  ;;  %v1737_v30 = vld [vmem:[%s5046_s12 + $0xb8] sm:$0xff] }
 0x462   : > { %v1526_v5 = vpop.f32.mrf.mxu1  ;;  %v1571_v41 = vpop.f32.mrf.mxu0  ;;  %2008 = vmatprep.subr.bf16.mxu0 %v4112_v2  ;;  %v4131_v37 = vcombine.low %v1732_v0, %v1740_v36  ;;  %v1745_v62 = vld [vmem:[%s5046_s12 + $0xf8] sm:$0xff] }
 0x463   : > { %v1604_v6 = vsel %vm501_vm2, %v1526_v5, 0.0  ;;  %v1591_v48 = vsel %vm501_vm2, %v1571_v41, 0.0  ;;  %2009 = vmatpush1.bf16.msra.mxu0 %v4111_v31  ;;  %v4132_v5 = vcombine.high %v1732_v0, %v1740_v36  ;;  %v1741_v41 = vld [vmem:[%s5046_s12 + $0xd8] sm:$0xff]  ;;  %v4142_v60 = vcombine.high %v1737_v30, %v1745_v62  ;;  %v1720_v31 = vld [vmem:[%s5046_s12 + $0x30] sm:$0xff] }
 0x464   : > { %v4599_v45 = vpop.f32.mrf.mxu1  ;;  %v4604_v46 = vpop.f32.mrf.mxu0  ;;  %v1605_v50 = vadd.f32 %v1604_v6, %v1603_v3  ;;  %v1592_v14 = vadd.f32 %v1591_v48, %v1590_v43  ;;  %v4133_v42 = vcombine.low %v1733_v23, %v1741_v41  ;;  %v4134_v6 = vcombine.high %v1733_v23, %v1741_v41  ;;  %v1729_v0 = vld [vmem:[%s5046_s12 + $0x78] sm:$0xff] }
 0x465   : > { %2092 = vmatprep.subr.bf16.mxu0 %v4132_v5  ;;  %v4141_v23 = vcombine.low %v1737_v30, %v1745_v62 }
 0x466   : > { %v1574_v29 = vpop.f32.mrf.mxu0 }
 0x467   : > { %v1606_v51 = vsel %vm501_vm2, %v1574_v29, 0.0 }
 0x468   : > { %v1607_v35 = vadd.f32 %v1606_v51, %v1605_v50  ;;  %v4605_v52 = vpop.f32.mrf.mxu0  ;;  %v5467_v50 = vsub.s32 2, %v5074_v9  ;;  %v5470_v51 = vsub.s32 3, %v5074_v9 }
 0x46a   : > { %v1612_v33 = vpack.c.bf16 %v1607_v35, %v1592_v14  ;;  %v1705_v14 = vrot.slane %v5444_v58, %v5467_v50 }
 0x46c   : > { %4611 = vmatmul.mubr.msk.bf16.vlgmr.msra.gmra.mxu1 %vm501_vm2, %v1612_v33  ;;  %v1711_v33 = vrot.slane %v5444_v58, %v5470_v51 }
 0x46d   : > { %2050 = vmatpush1.bf16.msra.mxu1 %v4129_v28  ;;  %2069 = vmatprep.mubr.bf16.mxu1 %v4951_v59  ;;  %v1744_v28 = vld [vmem:[%s5046_s12 + $0xf0] sm:$0xff] }
 0x46e   : > { %2051 = vmatprep.subr.bf16.mxu1 %v4114_v63  ;;  %v4140_v2 = vcombine.high %v1736_v27, %v1744_v28  ;;  %v1721_v63 = vld [vmem:[%s5046_s12 + $0x38] sm:$0xff]  ;;  %v4139_v36 = vcombine.low %v1736_v27, %v1744_v28 }
 0x46f   : > { %v4126_v5 = vcombine.high %v1721_v63, %v1729_v0 }
 0x471   : > { %2052 = vmatpush1.bf16.msra.mxu1 %v4113_v34  ;;  %v1728_v34 = vld [vmem:[%s5046_s12 + $0x70] sm:$0xff] }
 0x472   : > { %2135 = vmatprep.subr.bf16.mxu1 %v4134_v6  ;;  %v4123_v41 = vcombine.low %v1720_v31, %v1728_v34  ;;  %v4640_v6 = vld [vmem:[%s5052_s21 + $0x78] sm:$0xff]  }
 0x52c   : > { %v1666_v61 = vpop.f32.mrf.mxu1 }
 0x52d   : > { %v1667_v1 = vadd.f32 %v1666_v61, %v1616_v56 }
 0x52e   : > { %v4612_v26 = vpop.f32.mrf.mxu1 }
 0x52f   : > { %v1673_v38 = vadd.f32 %v4904_v40, %v1667_v1  ;;  %v1716_v26 = vld [vmem:[%s5046_s12 + $0x10] sm:$0xff] }
 0x530   : > { %v1669_v7 = vpop.f32.mrf.mxu1  ;;  %v1724_v40 = vld [vmem:[%s5046_s12 + $0x50] sm:$0xff] }
 0x531   : > { %v1670_v8 = vadd.f32 %v1669_v7, %v1616_v56  ;;  %v1675_v32 = vsel %vm501_vm2, %v1673_v38, 0.0  ;;  %v1725_v7 = vld [vmem:[%s5046_s12 + $0x58] sm:$0xff] }
 0x532   : > { %1676 = vadd.xlane.f32.xlu1 %v1675_v32  ;;  %v4613_v19 = vpop.f32.mrf.mxu1 }
 0x533   : > { %v1674_v47 = vadd.f32 %v4905_v11, %v1670_v8  ;;  %v4116_v11 = vcombine.high %v1716_v26, %v1724_v40 }
 0x535   : > { %v1678_v15 = vsel %vm501_vm2, %v1674_v47, 0.0 }
 0x536   : > { %1679 = vadd.xlane.f32.xlu0 %v1678_v15  ;;  %v1734_v15 = vld [vmem:[%s5046_s12 + $0xa0] sm:$0xff] }
 0x5bb   : > { %v1677_v16 = vpop.xlane.xlu1 %1676 }
 0x5bc   : > { %v1682_v17 = vmul.f32 0.03125, %v1677_v16  ;;  %v1742_v16 = vld [vmem:[%s5046_s12 + $0xe0] sm:$0xff] }
 0x5bd   : > { %v4135_v22 = vcombine.low %v1734_v15, %v1742_v16 }
 0x5be   : > { %v1684_v4 = vsub.f32 %v1673_v38, %v1682_v17  ;;  %v1717_v38 = vld [vmem:[%s5046_s12 + $0x18] sm:$0xff]  ;;  %v1735_v17 = vld [vmem:[%s5046_s12 + $0xa8] sm:$0xff] }
 0x5bf   : > { %v1680_v54 = vpop.xlane.xlu0 %1679 }
 0x5c0   : > { %v1683_v53 = vmul.f32 0.03125, %v1680_v54  ;;  %v1686_v10 = vmul.f32 %v1684_v4, %v1684_v4  ;;  %v4115_v54 = vcombine.low %v1716_v26, %v1724_v40  ;;  %v4656_v26 = vld [vmem:[%s5052_s21 + $0x58] sm:$0xff]  }
 0x5c1   : > { %v4657_v40 = vld [vmem:[%s5052_s21 + $0xd8] sm:$0xff]  }
 0x5c2   : > { %v1685_v39 = vsub.f32 %v1674_v47, %v1683_v53  ;;  %v1688_v44 = vsel %vm501_vm2, %v1686_v10, 0.0  ;;  %v4118_v47 = vcombine.high %v1717_v38, %v1725_v7  ;;  %v4117_v53 = vcombine.low %v1717_v38, %v1725_v7  ;;  %v4658_v38 = vld [vmem:[%s5052_s21 + $0x18] sm:$0xff]  }
 0x5c3   : > { %1689 = vadd.xlane.f32.xlu0 %v1688_v44  ;;  %v4136_v10 = vcombine.high %v1734_v15, %v1742_v16  ;;  %v1718_v44 = vld [vmem:[%s5046_s12 + $0x20] sm:$0xff]  ;;  %v4659_v7 = vld [vmem:[%s5052_s21 + $0x98] sm:$0xff]   ;;  %v4663_v15 = vld [vmem:[%s5052_s21 + $0x90] sm:$0xff]  }
 0x5c4   : > { %v1687_v18 = vmul.f32 %v1685_v39, %v1685_v39  ;;  %v4664_v16 = vld [vmem:[%s5052_s21 + $0x48] sm:$0xff]  }
 0x5c6   : > { %v1691_v49 = vsel %vm501_vm2, %v1687_v18, 0.0  ;;  %v1726_v18 = vld [vmem:[%s5046_s12 + $0x60] sm:$0xff] }
 0x5c7   : > { %1692 = vadd.xlane.f32.xlu1 %v1691_v49  ;;  %v1719_v49 = vld [vmem:[%s5046_s12 + $0x28] sm:$0xff]  ;;  %v4120_v24 = vcombine.high %v1718_v44, %v1726_v18  ;;  %v4119_v55 = vcombine.low %v1718_v44, %v1726_v18  ;;  %v4671_v44 = vld [vmem:[%s5052_s21 + $0x80] sm:$0xff]   ;;  %v4672_v18 = vld [vmem:[%s5052_s21 + $0x178] sm:$0xff]  }
 0x5c8   : > { %v4122_v25 = vcombine.high %v1719_v49, %v1727_v21  ;;  %v4121_v13 = vcombine.low %v1719_v49, %v1727_v21  ;;  %v4673_v49 = vld [vmem:[%s5052_s21 + $0x1f8] sm:$0xff]   ;;  %v5561_v21 = vld [vmem:[%s5041_s29] sm:$0xff] }
 0x5c9   : > { %v1762_v30 = vrot.slane %v5561_v21, %v5467_v50 }
 0x64c   : > { %v1690_v20 = vpop.xlane.xlu0 %1689 }
 0x64d   : > { %v1694_v3 = vmul.f32 0.03125, %v1690_v20  ;;  %v4641_v20 = vld [vmem:[%s5052_s21 + $0xf8] sm:$0xff]  }
 0x64f   : > { %v1696_v45 = vadd.f32 1e-05, %v1694_v3  ;;  %v4642_v3 = vld [vmem:[%s5052_s21 + $0x38] sm:$0xff]  }
 0x650   : > { %v1693_v46 = vpop.xlane.xlu1 %1692 }
 0x651   : > { %4832 = vrsqrt.f32 %v1696_v45  ;;  %v1695_v48 = vmul.f32 0.03125, %v1693_v46  ;;  %v4643_v45 = vld [vmem:[%s5052_s21 + $0xb8] sm:$0xff]   ;;  %v4644_v46 = vld [vmem:[%s5052_s21 + $0x70] sm:$0xff]  }
 0x653   : > { %v1697_v43 = vadd.f32 1e-05, %v1695_v48  ;;  %v4646_v48 = vld [vmem:[%s5052_s21 + $0x30] sm:$0xff]  }
 0x655   : > { %4834 = vrsqrt.f32 %v1697_v43  ;;  %v4647_v43 = vld [vmem:[%s5052_s21 + $0xb0] sm:$0xff]  }
 0x65e   : > { %v4833_v29 = vpop.eup %4832 }
 0x65f   : > { %v1700_v35 = vmul.f32 %v4833_v29, %v1684_v4  ;;  %v1743_v4 = vld [vmem:[%s5046_s12 + $0xe8] sm:$0xff] }
 0x660   : > { %v4137_v57 = vcombine.low %v1735_v17, %v1743_v4  ;;  %v4648_v29 = vld [vmem:[%s5052_s21 + $0x68] sm:$0xff]  }
 0x661   : > { %v1706_v56 = vmul.f32 %v1705_v14, %v1700_v35  ;;  %v4650_v35 = vld [vmem:[%s5052_s21 + $0x28] sm:$0xff]  }
 0x662   : > { %v4835_v52 = vpop.eup %4834 }
 0x663   : > { %v1701_v61 = vmul.f32 %v4835_v52, %v1685_v39  ;;  %v5480_v8 = vadd.f32 %v1711_v33, %v1706_v56  ;;  %v4138_v39 = vcombine.high %v1735_v17, %v1743_v4  ;;  %v4651_v52 = vld [vmem:[%s5052_s21 + $0xa8] sm:$0xff]   ;;  %v4653_v56 = vld [vmem:[%s5052_s21 + $0xe0] sm:$0xff]  }
 0x664   : > { %v4665_v17 = vld [vmem:[%s5052_s21 + $0xc8] sm:$0xff]  }
 0x665   : > { %v1707_v1 = vmul.f32 %v1705_v14, %v1701_v61  ;;  %v4649_v14 = vld [vmem:[%s5052_s21 + $0xe8] sm:$0xff]   ;;  %v4654_v61 = vld [vmem:[%s5052_s21 + $0x20] sm:$0xff]  }
 0x666   : > { %v4666_v4 = vld [vmem:[%s5052_s21 + $0x8] sm:$0xff]  }
 0x667   : > { %v5482_v32 = vadd.f32 %v1711_v33, %v1707_v1  ;;  %v4652_v33 = vld [vmem:[%s5052_s21 + $0x60] sm:$0xff]  }
 0x668   : > { %v4655_v1 = vld [vmem:[%s5052_s21 + $0xa0] sm:$0xff]  }
 0x669   : > { %v5486_v19 = vpack.c.bf16 %v5482_v32, %v5480_v8 }
 0x66b   : > { %4143 = vmatmul.mubr.msk.bf16.vlgmr.msra.gmra.mxu0 %vm501_vm2, %v5486_v19  ;;  %4144 = vmatmul.mubr.msk.bf16.vlgmr.msra.gmra.mxu1 %vm501_vm2, %v5486_v19 }
 0x66c   : > { %2093 = vmatpush1.bf16.msra.mxu0 %v4131_v37  ;;  %2136 = vmatpush1.bf16.msra.mxu1 %v4133_v42  ;;  %v4124_v37 = vcombine.high %v1720_v31, %v1728_v34  ;;  %v4125_v42 = vcombine.low %v1721_v63, %v1729_v0 }
 0x66d   : > { %2094 = vmatprep.subr.bf16.mxu0 %v4116_v11  ;;  %2137 = vmatprep.subr.bf16.mxu1 %v4118_v47  ;;  %v4661_v11 = vld [vmem:[%s5052_s21 + $0xd0] sm:$0xff]  }
 0x66e   : > { %2112 = vmatprep.mubr.bf16.mxu0 %v4951_v59  ;;  %2155 = vmatprep.mubr.bf16.mxu1 %v4951_v59  ;;  %v4662_v47 = vld [vmem:[%s5052_s21 + $0x10] sm:$0xff]  }
 0x670   : > { %2095 = vmatpush1.bf16.msra.mxu0 %v4115_v54  ;;  %2138 = vmatpush1.bf16.msra.mxu1 %v4117_v53  ;;  %v4667_v54 = vld [vmem:[%s5052_s21 + $0x88] sm:$0xff]   ;;  %v4668_v53 = vld [vmem:[%s5052_s21 + $0x40] sm:$0xff]  }
 0x671   : > { %2178 = vmatprep.subr.bf16.mxu0 %v4136_v10  ;;  %2221 = vmatprep.subr.bf16.mxu1 %v4138_v39  ;;  %v4669_v10 = vld [vmem:[%s5052_s21 + $0xc0] sm:$0xff]  }
 0x672   : > { %v4670_v39 = vld [vmem:[%s5052_s21] sm:$0xff]  }
 0x673   : > { %4145 = vmatmul.mubr.msk.bf16.vlgmr.msra.gmra.mxu0 %vm501_vm2, %v5486_v19  ;;  %4146 = vmatmul.mubr.msk.bf16.vlgmr.msra.gmra.mxu1 %vm501_vm2, %v5486_v19 }
 0x674   : > { %2179 = vmatpush1.bf16.msra.mxu0 %v4135_v22  ;;  %2222 = vmatpush1.bf16.msra.mxu1 %v4137_v57 }
 0x675   : > { %2180 = vmatprep.subr.bf16.mxu0 %v4120_v24  ;;  %2223 = vmatprep.subr.bf16.mxu1 %v4122_v25  ;;  %v5564_v24 = vsub.s32 1, %v5074_v9  ;;  %v1754_v25 = vrot.slane %v5561_v21, %v5083_v12 }
 0x676   : > { %2198 = vmatprep.mubr.bf16.mxu0 %v4951_v59  ;;  %2241 = vmatprep.mubr.bf16.mxu1 %v4951_v59 }
 0x677   : > { %v1758_v62 = vrot.slane %v5561_v21, %v5564_v24 }
 0x678   : > { %2181 = vmatpush1.bf16.msra.mxu0 %v4119_v55  ;;  %2224 = vmatpush1.bf16.msra.mxu1 %v4121_v13 }
 0x679   : > { %2264 = vmatprep.subr.bf16.mxu0 %v4140_v2  ;;  %2307 = vmatprep.subr.bf16.mxu1 %v4142_v60  ;;  %v1766_v60 = vrot.slane %v5561_v21, %v5470_v51 }
 0x67b   : > { %4147 = vmatmul.mubr.msk.bf16.vlgmr.msra.gmra.mxu0 %vm501_vm2, %v5486_v19  ;;  %4148 = vmatmul.mubr.msk.bf16.vlgmr.msra.gmra.mxu1 %vm501_vm2, %v5486_v19 }
 0x67c   : > { %2265 = vmatpush1.bf16.msra.mxu0 %v4139_v36  ;;  %2308 = vmatpush1.bf16.msra.mxu1 %v4141_v23 }
 0x67d   : > { %2266 = vmatprep.subr.bf16.mxu0 %v4124_v37  ;;  %2309 = vmatprep.subr.bf16.mxu1 %v4126_v5  ;;  %v5583_v37 = vsub.s32 5, %v5074_v9 }
 0x67e   : > { %2284 = vmatprep.mubr.bf16.mxu0 %v4951_v59  ;;  %2327 = vmatprep.mubr.bf16.mxu1 %v4951_v59  ;;  %v4645_v59 = vld [vmem:[%s5052_s21 + $0xf0] sm:$0xff]  }
 0x680   : > { %2267 = vmatpush1.bf16.msra.mxu0 %v4123_v41  ;;  %2310 = vmatpush1.bf16.msra.mxu1 %v4125_v42 }
 0x681   : > { %4326 = vmatprep.subr.bf16.mxu0 %v4640_v6  ;;  %4348 = vmatprep.subr.bf16.mxu1 %v4641_v20  ;;  %v5587_v6 = vsub.s32 7, %v5074_v9 }
 0x683   : > { %4149 = vmatmul.mubr.msk.bf16.vlgmr.msra.gmra.mxu0 %vm501_vm2, %v5486_v19  ;;  %4150 = vmatmul.mubr.msk.bf16.vlgmr.msra.gmra.mxu1 %vm501_vm2, %v5486_v19  ;;  %v4660_v19 = vld [vmem:[%s5052_s21 + $0x50] sm:$0xff]  }
 0x684   : > { %4327 = vmatpush3.bf16.msra.mxu0 %v4642_v3  ;;  %4349 = vmatpush3.bf16.msra.mxu1 %v4643_v45 }
 0x685   : > { %4328 = vmatprep.subr.bf16.mxu0 %v4644_v46  ;;  %4350 = vmatprep.subr.bf16.mxu1 %v4645_v59 }
 0x688   : > { %4329 = vmatpush3.bf16.msra.mxu0 %v4646_v48  ;;  %4351 = vmatpush3.bf16.msra.mxu1 %v4647_v43 }
 0x689   : > { %4330 = vmatprep.subr.bf16.mxu0 %v4648_v29  ;;  %4352 = vmatprep.subr.bf16.mxu1 %v4649_v14  ;;  %v1774_v14 = vrot.slane %v5561_v21, %v5583_v37 }
 0x68c   : > { %4331 = vmatpush3.bf16.msra.mxu0 %v4650_v35  ;;  %4353 = vmatpush3.bf16.msra.mxu1 %v4651_v52 }
 0x68d   : > { %4332 = vmatprep.subr.bf16.mxu0 %v4652_v33  ;;  %4354 = vmatprep.subr.bf16.mxu1 %v4653_v56  ;;  %v1782_v33 = vrot.slane %v5561_v21, %v5587_v6 }
 0x690   : > { %4333 = vmatpush3.bf16.msra.mxu0 %v4654_v61  ;;  %4355 = vmatpush3.bf16.msra.mxu1 %v4655_v1 }
 0x691   : > { %4334 = vmatprep.subr.bf16.mxu0 %v4656_v26  ;;  %4356 = vmatprep.subr.bf16.mxu1 %v4657_v40 }
 0x694   : > { %4335 = vmatpush3.bf16.msra.mxu0 %v4658_v38  ;;  %4357 = vmatpush3.bf16.msra.mxu1 %v4659_v7 }
 0x695   : > { %4336 = vmatprep.subr.bf16.mxu0 %v4660_v19  ;;  %4358 = vmatprep.subr.bf16.mxu1 %v4661_v11 }
 0x698   : > { %4337 = vmatpush3.bf16.msra.mxu0 %v4662_v47  ;;  %4359 = vmatpush3.bf16.msra.mxu1 %v4663_v15 }
 0x699   : > { %4338 = vmatprep.subr.bf16.mxu0 %v4664_v16  ;;  %4360 = vmatprep.subr.bf16.mxu1 %v4665_v17 }
 0x69c   : > { %4339 = vmatpush3.bf16.msra.mxu0 %v4666_v4  ;;  %4361 = vmatpush3.bf16.msra.mxu1 %v4667_v54 }
 0x69d   : > { %4340 = vmatprep.subr.bf16.mxu0 %v4668_v53  ;;  %4362 = vmatprep.subr.bf16.mxu1 %v4669_v10 }
 0x6a0   : > { %4341 = vmatpush3.bf16.msra.mxu0 %v4670_v39  ;;  %4363 = vmatpush3.bf16.msra.mxu1 %v4671_v44  ;;  %v5614_v39 = vsub.s32 4, %v5074_v9 }
 0x6a1   : > { %4370 = vmatprep.subr.bf16.mxu0 %v4672_v18  ;;  %4392 = vmatprep.subr.bf16.mxu1 %v4673_v49  ;;  %v5617_v49 = vsub.s32 6, %v5074_v9 }
 0x6a3   : > { %v1778_v9 = vrot.slane %v5561_v21, %v5617_v49 }
 0x72b   : > { %v2028_v22 = vpop.f32.mrf.mxu0  ;;  %v2071_v57 = vpop.f32.mrf.mxu1 }
 0x72c   : > { %v5572_v2 = vadd.f32 %v2028_v22, %v1754_v25  ;;  %v2072_v63 = vadd.f32 %v2071_v57, %v1762_v30 }
 0x72d   : > { %v2030_v27 = vpop.f32.mrf.mxu0  ;;  %v2073_v28 = vpop.f32.mrf.mxu1 }
 0x72e   : > { %v5576_v0 = vadd.f32 %v2030_v27, %v1758_v62  ;;  %v2370_v5 = vmul.f32 0.70710677, %v5572_v2  ;;  %v2074_v41 = vadd.f32 %v2073_v28, %v1766_v60  ;;  %v2372_v3 = vmul.f32 0.70710677, %v2072_v63 }
 0x72f   : > { %v2032_v55 = vpop.f32.mrf.mxu0  ;;  %v2075_v13 = vpop.f32.mrf.mxu1  ;;  %v1770_v27 = vrot.slane %v5561_v21, %v5614_v39 }
 0x730   : > { %v2033_v45 = vadd.f32 %v2032_v55, %v1754_v25  ;;  %v2371_v46 = vmul.f32 0.70710677, %v5576_v0  ;;  %v2076_v59 = vadd.f32 %v2075_v13, %v1762_v30  ;;  %4836 = verf.f32 %v2370_v5 }
 0x731   : > { %v2034_v31 = vpop.f32.mrf.mxu0  ;;  %v2077_v34 = vpop.f32.mrf.mxu1  ;;  %v2373_v35 = vmul.f32 0.70710677, %v2074_v41  ;;  %4838 = verf.f32 %v2372_v3  ;;  %v2338_v13 = vmul.f32 0.5, %v5572_v2  ;;  %v2339_v5 = vmul.f32 0.5, %v5576_v0 }
 0x732   : > { %v5594_v29 = vadd.f32 %v2034_v31, %v1758_v62  ;;  %v5598_v52 = vadd.f32 %v2077_v34, %v1766_v60  ;;  %v2386_v1 = vmul.f32 0.70710677, %v2033_v45  ;;  %4840 = verf.f32 %v2371_v46  ;;  %v5626_v62 = vld [vmem:[%s5041_s29 + $0x8] sm:$0xff] }
 0x733   : > { %v5578_v36 = vpop.f32.mrf.mxu0  ;;  %v5580_v23 = vpop.f32.mrf.mxu1  ;;  %v2388_v26 = vmul.f32 0.70710677, %v2076_v59  ;;  %4842 = verf.f32 %v2373_v35  ;;  %v2340_v60 = vmul.f32 0.5, %v2072_v63  ;;  %v5633_v31 = vrot.slane %v5626_v62, %v5564_v24 }
 0x734   : > { %v2387_v40 = vmul.f32 0.70710677, %v5594_v29  ;;  %v2389_v11 = vmul.f32 0.70710677, %v5598_v52  ;;  %4844 = verf.f32 %v2386_v1  ;;  %v5639_v63 = vadd.f32 %v5578_v36, %v1770_v27 }
 0x735   : > { %v2116_v42 = vpop.f32.mrf.mxu0  ;;  %v2159_v20 = vpop.f32.mrf.mxu1  ;;  %4846 = verf.f32 %v2388_v26  ;;  %v2355_v26 = vmul.f32 0.5, %v5594_v29 }
 0x736   : > { %v5603_v38 = vadd.f32 %v2116_v42, %v1774_v14  ;;  %v5608_v47 = vadd.f32 %v2159_v20, %v1782_v33  ;;  %4848 = verf.f32 %v2387_v40  ;;  %v2341_v42 = vmul.f32 0.5, %v2074_v41 }
 0x737   : > { %v5590_v48 = vpop.f32.mrf.mxu0  ;;  %v5592_v43 = vpop.f32.mrf.mxu1  ;;  %4850 = verf.f32 %v2389_v11  ;;  %v2354_v20 = vmul.f32 0.5, %v2033_v45  ;;  %v2357_v40 = vmul.f32 0.5, %v5598_v52 }
 0x738   : > { %v2375_v17 = vmul.f32 0.70710677, %v5603_v38  ;;  %v2377_v4 = vmul.f32 0.70710677, %v5608_v47 }
 0x739   : > { %v2120_v56 = vpop.f32.mrf.mxu0  ;;  %v2163_v61 = vpop.f32.mrf.mxu1 }
 0x73a   : > { %v2121_v7 = vadd.f32 %v2120_v56, %v1774_v14  ;;  %v5605_v19 = vadd.f32 %v2163_v61, %v1782_v33  ;;  %v2356_v33 = vmul.f32 0.5, %v2076_v59 }
 0x73b   : > { %v5619_v57 = vpop.f32.mrf.mxu0  ;;  %v5623_v28 = vpop.f32.mrf.mxu1 }
 0x73c   : > { %v2391_v15 = vmul.f32 0.70710677, %v2121_v7  ;;  %v2393_v16 = vmul.f32 0.70710677, %v5605_v19 }
 0x73d   : > { %v4837_v54 = vpop.eup %4836  ;;  %v5636_v46 = vpop.f32.mrf.mxu0 }
 0x73e   : > { %4852 = verf.f32 %v2391_v15  ;;  %v4839_v53 = vpop.eup %4838  ;;  %v5641_v21 = vpop.f32.mrf.mxu1  ;;  %v2434_v41 = vadd.f32 1.0, %v4837_v54 }
 0x73f   : > { %4854 = verf.f32 %v2393_v16  ;;  %v4841_v10 = vpop.eup %4840  ;;  %v2436_v15 = vadd.f32 1.0, %v4839_v53 }
 0x740   : > { %4856 = verf.f32 %v2375_v17  ;;  %v4843_v44 = vpop.eup %4842  ;;  %v2435_v61 = vadd.f32 1.0, %v4841_v10  ;;  %v2359_v17 = vmul.f32 0.5, %v2121_v7  ;;  %v2361_v10 = vmul.f32 0.5, %v5605_v19 }
 0x741   : > { %4858 = verf.f32 %v2377_v4  ;;  %v4845_v18 = vpop.eup %4844  ;;  %v2437_v45 = vadd.f32 1.0, %v4843_v44  ;;  %v5645_v4 = vpop.f32.mrf.mxu0  ;;  %v2343_v44 = vmul.f32 0.5, %v5603_v38  ;;  %v2466_v53 = vmul.f32 %v2434_v41, %v2338_v13 }
 0x742   : > { %v4847_v22 = vpop.eup %4846  ;;  %v2450_v35 = vadd.f32 1.0, %v4845_v18  ;;  %v2467_v29 = vmul.f32 %v2435_v61, %v2339_v5  ;;  %v2345_v7 = vmul.f32 0.5, %v5608_v47  ;;  %v4674_v5 = vld [vmem:[%s5052_s21 + $0x138] sm:$0xff]   ;;  %v5657_v38 = vadd.f32 %v5590_v48, %v1770_v27  ;;  %v4677_v61 = vld [vmem:[%s5052_s21 + $0x1f0] sm:$0xff]  }
 0x743   : > { %v4849_v25 = vpop.eup %4848  ;;  %v2452_v1 = vadd.f32 1.0, %v4847_v22  ;;  %v5648_v22 = vpop.f32.mrf.mxu1  ;;  %v2374_v48 = vmul.f32 0.70710677, %v5639_v63  ;;  %v5678_v41 = vadd.f32 %v5636_v46, %v5633_v31 }
 0x744   : > { %v4851_v30 = vpop.eup %4850  ;;  %v2451_v3 = vadd.f32 1.0, %v4849_v25  ;;  %v2482_v36 = vmul.f32 %v2450_v35, %v2354_v20  ;;  %v5653_v20 = vadd.f32 %v5580_v23, %v1778_v9  ;;  %v1798_v23 = vrot.slane %v5626_v62, %v5470_v51  ;;  %v4678_v51 = vld [vmem:[%s5052_s21 + $0x130] sm:$0xff]  }
 0x745   : > { %v2453_v2 = vadd.f32 1.0, %v4851_v30  ;;  %v2484_v54 = vmul.f32 %v2452_v1, %v2356_v33  ;;  %v2469_v30 = vmul.f32 %v2437_v45, %v2341_v42  ;;  %v2249_v13 = vpop.f32.mrf.mxu1  ;;  %v4675_v42 = vld [vmem:[%s5052_s21 + $0x1b8] sm:$0xff]   ;;  %v4679_v45 = vld [vmem:[%s5052_s21 + $0x1b0] sm:$0xff]   ;;  %4860 = verf.f32 %v2374_v48  ;;  %v4699_v48 = vld [vmem:[%s5052_s21 + $0x188] sm:$0xff]  }
 0x746   : > { %v2483_v16 = vmul.f32 %v2451_v3, %v2355_v26  ;;  %v2206_v3 = vpop.f32.mrf.mxu0  ;;  %v2754_v35 = vpack.c.bf16 %v2482_v36, %v2466_v53  ;;  %v4684_v36 = vld [vmem:[%s5052_s21 + $0x160] sm:$0xff]   ;;  %v4691_v53 = vld [vmem:[%s5052_s21 + $0x198] sm:$0xff]  }
 0x747   : > { %v2485_v18 = vmul.f32 %v2453_v2, %v2357_v40  ;;  %v5669_v27 = vadd.f32 %v2206_v3, %v5633_v31  ;;  %v4680_v40 = vld [vmem:[%s5052_s21 + $0x168] sm:$0xff]  }
 0x749   : > { %v2757_v2 = vpack.c.bf16 %v2485_v18, %v2469_v30  ;;  %v2395_v31 = vmul.f32 0.70710677, %v5669_v27  ;;  %v4692_v30 = vld [vmem:[%s5052_s21 + $0x150] sm:$0xff]  }
 0x74b   : > { %v4853_v55 = vpop.eup %4852  ;;  %3615 = vmatprep.mubr.bf16.mxu1 %v2757_v2 }
 0x74c   : > { %v4855_v34 = vpop.eup %4854  ;;  %v2455_v0 = vadd.f32 1.0, %v4853_v55 }
 0x74d   : > { %v4857_v14 = vpop.eup %4856  ;;  %v2457_v11 = vadd.f32 1.0, %v4855_v34  ;;  %v2468_v34 = vmul.f32 %v2436_v15, %v2340_v60  ;;  %v5662_v60 = vadd.f32 %v5592_v43, %v1778_v9  ;;  %v2376_v43 = vmul.f32 0.70710677, %v5653_v20 }
 0x74e   : > { %v4859_v56 = vpop.eup %4858  ;;  %v2439_v59 = vadd.f32 1.0, %v4857_v14  ;;  %v2487_v52 = vmul.f32 %v2455_v0, %v2359_v17  ;;  %v2755_v14 = vpack.c.bf16 %v2483_v16, %v2467_v29  ;;  %v5672_v9 = vadd.f32 %v2249_v13, %v1798_v23  ;;  %v4681_v16 = vld [vmem:[%s5052_s21 + $0x1e8] sm:$0xff]   ;;  %v4687_v29 = vld [vmem:[%s5052_s21 + $0x1a0] sm:$0xff]  }
 0x74f   : > { %v2441_v25 = vadd.f32 1.0, %v4859_v56  ;;  %v2489_v55 = vmul.f32 %v2457_v11, %v2361_v10  ;;  %v4676_v56 = vld [vmem:[%s5052_s21 + $0x170] sm:$0xff]   ;;  %v2756_v47 = vpack.c.bf16 %v2484_v54, %v2468_v34  ;;  %v2390_v0 = vmul.f32 0.70710677, %v5657_v38  ;;  %v4686_v10 = vld [vmem:[%s5052_s21 + $0x120] sm:$0xff]   ;;  %v4688_v54 = vld [vmem:[%s5052_s21 + $0x158] sm:$0xff]   ;;  %v5703_v34 = vpop.f32.mrf.mxu0 }
 0x750   : > { %v2471_v19 = vmul.f32 %v2439_v59, %v2343_v44  ;;  %3574 = vmatprep.mubr.bf16.mxu0 %v2755_v14  ;;  %v2392_v11 = vmul.f32 0.70710677, %v5662_v60  ;;  %v5684_v15 = vadd.f32 %v5641_v21, %v1798_v23  ;;  %4862 = verf.f32 %v2376_v43  ;;  %v4682_v59 = vld [vmem:[%s5052_s21 + $0x128] sm:$0xff]   ;;  %v4689_v44 = vld [vmem:[%s5052_s21 + $0x1d8] sm:$0xff]   ;;  %v5706_v14 = vpop.f32.mrf.mxu1 }
 0x751   : > { %v2473_v33 = vmul.f32 %v2441_v25, %v2345_v7  ;;  %3575 = vmatmul.mubr.bf16.vlgmr.msra.gmra.mxu0 %v2754_v35  ;;  %3616 = vmatmul.mubr.bf16.vlgmr.msra.gmra.mxu1 %v2756_v47  ;;  %v2397_v46 = vmul.f32 0.70710677, %v5672_v9  ;;  %4864 = verf.f32 %v2390_v0  ;;  %v2379_v17 = vmul.f32 0.70710677, %v5678_v41  ;;  %v4683_v21 = vld [vmem:[%s5052_s21 + $0x1a8] sm:$0xff]   ;;  %v4685_v25 = vld [vmem:[%s5052_s21 + $0x1e0] sm:$0xff]  }
 0x752   : > { %v2759_v1 = vpack.c.bf16 %v2487_v52, %v2471_v19  ;;  %4371 = vmatpush3.bf16.msra.mxu0 %v4674_v5  ;;  %4393 = vmatpush3.bf16.msra.mxu1 %v4675_v42  ;;  %4866 = verf.f32 %v2392_v11  ;;  %v2381_v18 = vmul.f32 0.70710677, %v5684_v15  ;;  %v4690_v52 = vld [vmem:[%s5052_s21 + $0x118] sm:$0xff]   ;;  %v4693_v7 = vld [vmem:[%s5052_s21 + $0x1d0] sm:$0xff]   ;;  %v4696_v35 = vld [vmem:[%s5052_s21 + $0x148] sm:$0xff]   ;;  %v1786_v0 = vrot.slane %v5626_v62, %v5083_v12 }
 0x753   : > { %v2761_v26 = vpack.c.bf16 %v2489_v55, %v2473_v33  ;;  %4372 = vmatprep.subr.bf16.mxu0 %v4676_v56  ;;  %4394 = vmatprep.subr.bf16.mxu1 %v4677_v61  ;;  %4868 = verf.f32 %v2395_v31  ;;  %v4861_v55 = vpop.eup %4860  ;;  %v4694_v19 = vld [vmem:[%s5052_s21 + $0x110] sm:$0xff]   ;;  %v4697_v13 = vld [vmem:[%s5052_s21 + $0x1c8] sm:$0xff]   ;;  %v5711_v56 = vpop.f32.mrf.mxu0  ;;  %v1794_v31 = vrot.slane %v5626_v62, %v5467_v50  ;;  %v2363_v50 = vmul.f32 0.5, %v5669_v27 }
 0x754   : > { %3656 = vmatprep.mubr.bf16.mxu0 %v2759_v1  ;;  %4870 = verf.f32 %v2397_v46  ;;  %v4695_v5 = vld [vmem:[%s5052_s21 + $0x190] sm:$0xff]   ;;  %v4698_v47 = vld [vmem:[%s5052_s21 + $0x108] sm:$0xff]   ;;  %v5714_v1 = vpop.f32.mrf.mxu1  ;;  %v2438_v11 = vadd.f32 1.0, %v4861_v55  ;;  %v5740_v55 = vadd.f32 %v5619_v57, %v1786_v0  ;;  %v2347_v27 = vmul.f32 0.5, %v5678_v41  ;;  %v4707_v41 = vld [vmem:[%s5052_s21 + $0x2b8] sm:$0xff]  }
 0x755   : > { %3697 = vmatprep.mubr.bf16.mxu1 %v2761_v26  ;;  %4872 = verf.f32 %v2379_v17  ;;  %v4700_v26 = vld [vmem:[%s5052_s21 + $0x140] sm:$0xff]   ;;  %v2360_v17 = vmul.f32 0.5, %v5662_v60  ;;  %v5727_v12 = vpop.f32.mrf.mxu0  ;;  %v5749_v57 = vadd.f32 %v5645_v4, %v1786_v0 }
 0x756   : > { %4373 = vmatpush3.bf16.msra.mxu0 %v4678_v51  ;;  %4395 = vmatpush3.bf16.msra.mxu1 %v4679_v45  ;;  %4874 = verf.f32 %v2381_v18  ;;  %v4701_v45 = vld [vmem:[%s5052_s21 + $0x1c0] sm:$0xff]  }
 0x757   : > { %4374 = vmatprep.subr.bf16.mxu0 %v4680_v40  ;;  %4396 = vmatprep.subr.bf16.mxu1 %v4681_v16  ;;  %v2358_v16 = vmul.f32 0.5, %v5657_v38  ;;  %v4702_v18 = vld [vmem:[%s5052_s21 + $0x100] sm:$0xff]   ;;  %v2342_v38 = vmul.f32 0.5, %v5639_v63 }
 0x758   : > { %v4703_v60 = vld [vmem:[%s5052_s21 + $0x180] sm:$0xff]  }
 0x759   : > { %v2470_v63 = vmul.f32 %v2438_v11, %v2342_v38  ;;  %v4716_v38 = vld [vmem:[%s5052_s21 + $0x260] sm:$0xff]  }
 0x75a   : > { %4375 = vmatpush3.bf16.msra.mxu0 %v4682_v59  ;;  %4397 = vmatpush3.bf16.msra.mxu1 %v4683_v21 }
 0x75b   : > { %4376 = vmatprep.subr.bf16.mxu0 %v4684_v36  ;;  %4398 = vmatprep.subr.bf16.mxu1 %v4685_v25  ;;  %v1806_v36 = vrot.slane %v5626_v62, %v5583_v37 }
 0x75d   : > { %v4863_v3 = vpop.eup %4862  ;;  %v5768_v11 = vadd.f32 %v5711_v56, %v1806_v36 }
 0x75e   : > { %4377 = vmatpush3.bf16.msra.mxu0 %v4686_v10  ;;  %4399 = vmatpush3.bf16.msra.mxu1 %v4687_v29  ;;  %v4865_v33 = vpop.eup %4864  ;;  %v2440_v59 = vadd.f32 1.0, %v4863_v3  ;;  %v5732_v29 = vpop.f32.mrf.mxu1 }
 0x75f   : > { %4378 = vmatprep.subr.bf16.mxu0 %v4688_v54  ;;  %4400 = vmatprep.subr.bf16.mxu1 %v4689_v44  ;;  %v4867_v2 = vpop.eup %4866  ;;  %v2454_v61 = vadd.f32 1.0, %v4865_v33  ;;  %v4704_v54 = vld [vmem:[%s5052_s21 + $0x278] sm:$0xff]   ;;  %v2344_v44 = vmul.f32 0.5, %v5653_v20  ;;  %v2349_v20 = vmul.f32 0.5, %v5684_v15  ;;  %v2292_v33 = vpop.f32.mrf.mxu0  ;;  %v5753_v15 = vadd.f32 %v5648_v22, %v1794_v31 }
 0x760   : > { %v4869_v42 = vpop.eup %4868  ;;  %v2456_v51 = vadd.f32 1.0, %v4867_v2  ;;  %v5759_v4 = vadd.f32 %v2292_v33, %v1806_v36  ;;  %v4714_v36 = vld [vmem:[%s5052_s21 + $0x228] sm:$0xff]  }
 0x761   : > { %v4871_v23 = vpop.eup %4870  ;;  %v2459_v46 = vadd.f32 1.0, %v4869_v42  ;;  %v2486_v25 = vmul.f32 %v2454_v61, %v2358_v16  ;;  %v2472_v3 = vmul.f32 %v2440_v59, %v2344_v44  ;;  %v2335_v42 = vpop.f32.mrf.mxu1  ;;  %v4708_v61 = vld [vmem:[%s5052_s21 + $0x270] sm:$0xff]   ;;  %v4721_v44 = vld [vmem:[%s5052_s21 + $0x2d8] sm:$0xff]   ;;  %v4729_v33 = vld [vmem:[%s5052_s21 + $0x2c8] sm:$0xff]  }
 0x762   : > { %4379 = vmatpush3.bf16.msra.mxu0 %v4690_v52  ;;  %4401 = vmatpush3.bf16.msra.mxu1 %v4691_v53  ;;  %v4873_v43 = vpop.eup %4872  ;;  %v2461_v21 = vadd.f32 1.0, %v4871_v23  ;;  %v2488_v52 = vmul.f32 %v2456_v51, %v2360_v17  ;;  %v1814_v23 = vrot.slane %v5626_v62, %v5587_v6  ;;  %v4711_v16 = vld [vmem:[%s5052_s21 + $0x2b0] sm:$0xff]   ;;  %v4713_v17 = vld [vmem:[%s5052_s21 + $0x2e8] sm:$0xff]   ;;  %v2399_v56 = vmul.f32 0.70710677, %v5759_v4 }
 0x763   : > { %4380 = vmatprep.subr.bf16.mxu0 %v4692_v30  ;;  %4402 = vmatprep.subr.bf16.mxu1 %v4693_v7  ;;  %v4875_v40 = vpop.eup %4874  ;;  %v2443_v10 = vadd.f32 1.0, %v4873_v43  ;;  %v2365_v30 = vmul.f32 0.5, %v5672_v9  ;;  %v4705_v7 = vld [vmem:[%s5052_s21 + $0x2f8] sm:$0xff]   ;;  %v4709_v43 = vld [vmem:[%s5052_s21 + $0x2f0] sm:$0xff]  }
 0x764   : > { %v2445_v53 = vadd.f32 1.0, %v4875_v40  ;;  %v4706_v9 = vld [vmem:[%s5052_s21 + $0x238] sm:$0xff]   ;;  %v5763_v0 = vadd.f32 %v2335_v42, %v1814_v23  ;;  %v2394_v40 = vmul.f32 0.70710677, %v5749_v57  ;;  %v5774_v59 = vadd.f32 %v5714_v1, %v1814_v23  ;;  %v4715_v1 = vld [vmem:[%s5052_s21 + $0x2a8] sm:$0xff]  }
 0x765   : > { %v2475_v2 = vmul.f32 %v2443_v10, %v2347_v27  ;;  %v4717_v10 = vld [vmem:[%s5052_s21 + $0x2e0] sm:$0xff]   ;;  %v4726_v27 = vld [vmem:[%s5052_s21 + $0x210] sm:$0xff]  }
 0x766   : > { %4381 = vmatpush3.bf16.msra.mxu0 %v4694_v19  ;;  %4403 = vmatpush3.bf16.msra.mxu1 %v4695_v5  ;;  %v2491_v19 = vmul.f32 %v2459_v46, %v2363_v50  ;;  %v5744_v5 = vadd.f32 %v5623_v28, %v1794_v31  ;;  %v2477_v28 = vmul.f32 %v2445_v53, %v2349_v20  ;;  %v4712_v31 = vld [vmem:[%s5052_s21 + $0x268] sm:$0xff]   ;;  %v2396_v46 = vmul.f32 0.70710677, %v5753_v15  ;;  %v4718_v50 = vld [vmem:[%s5052_s21 + $0x220] sm:$0xff]   ;;  %v4723_v53 = vld [vmem:[%s5052_s21 + $0x298] sm:$0xff]  }
 0x767   : > { %4382 = vmatprep.subr.bf16.mxu0 %v4696_v35  ;;  %4404 = vmatprep.subr.bf16.mxu1 %v4697_v13  ;;  %v2493_v35 = vmul.f32 %v2461_v21, %v2365_v30  ;;  %v2758_v13 = vpack.c.bf16 %v2486_v25, %v2470_v63  ;;  %v2401_v21 = vmul.f32 0.70710677, %v5763_v0  ;;  %v2385_v25 = vmul.f32 0.70710677, %v5774_v59  ;;  %v4724_v30 = vld [vmem:[%s5052_s21 + $0x250] sm:$0xff]   ;;  %v4728_v20 = vld [vmem:[%s5052_s21 + $0x248] sm:$0xff]  }
 0x768   : > { %v2380_v51 = vmul.f32 0.70710677, %v5744_v5 }
 0x769   : > { %v2765_v22 = vpack.c.bf16 %v2493_v35, %v2477_v28  ;;  %v4732_v28 = vld [vmem:[%s5052_s21 + $0x240] sm:$0xff]  }
 0x76a   : > { %4383 = vmatpush3.bf16.msra.mxu0 %v4698_v47  ;;  %4405 = vmatpush3.bf16.msra.mxu1 %v4699_v48  ;;  %v2760_v47 = vpack.c.bf16 %v2488_v52, %v2472_v3  ;;  %v2378_v48 = vmul.f32 0.70710677, %v5740_v55  ;;  %v4722_v52 = vld [vmem:[%s5052_s21 + $0x218] sm:$0xff]   ;;  %v4727_v3 = vld [vmem:[%s5052_s21 + $0x290] sm:$0xff]  }
 0x76b   : > { %4384 = vmatprep.subr.bf16.mxu0 %v4700_v26  ;;  %4406 = vmatprep.subr.bf16.mxu1 %v4701_v45  ;;  %v2763_v26 = vpack.c.bf16 %v2491_v19, %v2475_v2  ;;  %v4710_v45 = vld [vmem:[%s5052_s21 + $0x230] sm:$0xff]   ;;  %v4730_v2 = vld [vmem:[%s5052_s21 + $0x208] sm:$0xff]  }
 0x76c   : > { %4876 = verf.f32 %v2378_v48  ;;  %v4733_v48 = vld [vmem:[%s5052_s21 + $0x2c0] sm:$0xff]  }
 0x76d   : > { %4878 = verf.f32 %v2380_v51  ;;  %v2362_v51 = vmul.f32 0.5, %v5749_v57  ;;  %v2348_v57 = vmul.f32 0.5, %v5744_v5  ;;  %v2353_v5 = vmul.f32 0.5, %v5774_v59  ;;  %v4740_v59 = vld [vmem:[%s5052_s21 + $0x370] sm:$0xff]  }
 0x76e   : > { %4385 = vmatpush3.bf16.msra.mxu0 %v4702_v18  ;;  %4407 = vmatpush3.bf16.msra.mxu1 %v4703_v60  ;;  %4880 = verf.f32 %v2394_v40  ;;  %v2383_v18 = vmul.f32 0.70710677, %v5768_v11  ;;  %v4719_v60 = vld [vmem:[%s5052_s21 + $0x2a0] sm:$0xff]   ;;  %v2364_v40 = vmul.f32 0.5, %v5753_v15  ;;  %v2369_v15 = vmul.f32 0.5, %v5763_v0  ;;  %v4738_v0 = vld [vmem:[%s5052_s21 + $0x338] sm:$0xff]  }
 0x76f   : > { %4414 = vmatprep.subr.bf16.mxu0 %v4704_v54  ;;  %4436 = vmatprep.subr.bf16.mxu1 %v4705_v7  ;;  %4882 = verf.f32 %v2396_v46  ;;  %v4720_v54 = vld [vmem:[%s5052_s21 + $0x258] sm:$0xff]   ;;  %v4725_v7 = vld [vmem:[%s5052_s21 + $0x2d0] sm:$0xff]   ;;  %v2346_v46 = vmul.f32 0.5, %v5740_v55  ;;  %v1802_v55 = vrot.slane %v5626_v62, %v5614_v39 }
 0x770   : > { %4884 = verf.f32 %v2399_v56 }
 0x771   : > { %3657 = vmatmul.mubr.bf16.vlgmr.msra.gmra.mxu0 %v2758_v13  ;;  %3698 = vmatmul.mubr.bf16.vlgmr.msra.gmra.mxu1 %v2760_v47  ;;  %4886 = verf.f32 %v2401_v21  ;;  %v4731_v47 = vld [vmem:[%s5052_s21 + $0x288] sm:$0xff]   ;;  %v2367_v21 = vmul.f32 0.5, %v5759_v4  ;;  %v2351_v4 = vmul.f32 0.5, %v5768_v11  ;;  %v4739_v11 = vld [vmem:[%s5052_s21 + $0x3b8] sm:$0xff]  }
 0x772   : > { %4415 = vmatpush3.bf16.msra.mxu0 %v4706_v9  ;;  %3738 = vmatprep.mubr.bf16.mxu0 %v2763_v26  ;;  %4888 = verf.f32 %v2383_v18  ;;  %v4736_v18 = vld [vmem:[%s5052_s21 + $0x378] sm:$0xff]  }
 0x773   : > { %4437 = vmatpush3.bf16.msra.mxu1 %v4707_v41  ;;  %3779 = vmatprep.mubr.bf16.mxu1 %v2765_v22  ;;  %4890 = verf.f32 %v2385_v25  ;;  %v4737_v25 = vld [vmem:[%s5052_s21 + $0x3f8] sm:$0xff]  }
 0x774   : > { %4416 = vmatprep.subr.bf16.mxu0 %v4708_v61  ;;  %4438 = vmatprep.subr.bf16.mxu1 %v4709_v43 }
 0x776   : > { %4417 = vmatpush3.bf16.msra.mxu0 %v4710_v45 }
 0x777   : > { %4439 = vmatpush3.bf16.msra.mxu1 %v4711_v16  ;;  %4418 = vmatprep.subr.bf16.mxu0 %v4712_v31  ;;  %v4734_v31 = vld [vmem:[%s5052_s21 + $0x200] sm:$0xff]  }
 0x778   : > { %4440 = vmatprep.subr.bf16.mxu1 %v4713_v17 }
 0x779   : > { %v4877_v63 = vpop.eup %4876 }
 0x77a   : > { %4419 = vmatpush3.bf16.msra.mxu0 %v4714_v36  ;;  %v4879_v19 = vpop.eup %4878  ;;  %v2442_v43 = vadd.f32 1.0, %v4877_v63  ;;  %v4735_v36 = vld [vmem:[%s5052_s21 + $0x280] sm:$0xff]  }
 0x77b   : > { %4441 = vmatpush3.bf16.msra.mxu1 %v4715_v1  ;;  %4420 = vmatprep.subr.bf16.mxu0 %v4716_v38  ;;  %v4881_v35 = vpop.eup %4880  ;;  %v2444_v45 = vadd.f32 1.0, %v4879_v19  ;;  %v4741_v19 = vld [vmem:[%s5052_s21 + $0x3f0] sm:$0xff]  }
 0x77c   : > { %4442 = vmatprep.subr.bf16.mxu1 %v4717_v10  ;;  %v4883_v9 = vpop.eup %4882  ;;  %v2458_v41 = vadd.f32 1.0, %v4881_v35  ;;  %v2474_v10 = vmul.f32 %v2442_v43, %v2346_v46  ;;  %v4742_v35 = vld [vmem:[%s5052_s21 + $0x330] sm:$0xff]   ;;  %v4754_v43 = vld [vmem:[%s5052_s21 + $0x318] sm:$0xff]  }
 0x77d   : > { %v4885_v13 = vpop.eup %4884  ;;  %v2460_v61 = vadd.f32 1.0, %v4883_v9 }
 0x77e   : > { %4421 = vmatpush3.bf16.msra.mxu0 %v4718_v50  ;;  %v4887_v42 = vpop.eup %4886  ;;  %v2463_v22 = vadd.f32 1.0, %v4885_v13  ;;  %v2490_v17 = vmul.f32 %v2458_v41, %v2362_v51  ;;  %v4747_v41 = vld [vmem:[%s5052_s21 + $0x3a8] sm:$0xff]   ;;  %v4755_v51 = vld [vmem:[%s5052_s21 + $0x398] sm:$0xff]  }
 0x77f   : > { %4443 = vmatpush3.bf16.msra.mxu1 %v4719_v60  ;;  %4422 = vmatprep.subr.bf16.mxu0 %v4720_v54  ;;  %v4889_v23 = vpop.eup %4888  ;;  %v2465_v16 = vadd.f32 1.0, %v4887_v42  ;;  %v2492_v1 = vmul.f32 %v2460_v61, %v2364_v40  ;;  %v2476_v60 = vmul.f32 %v2444_v45, %v2348_v57  ;;  %v1810_v54 = vrot.slane %v5626_v62, %v5617_v49  ;;  %v4746_v42 = vld [vmem:[%s5052_s21 + $0x328] sm:$0xff]   ;;  %v4751_v61 = vld [vmem:[%s5052_s21 + $0x3a0] sm:$0xff]   ;;  %v4757_v45 = vld [vmem:[%s5052_s21 + $0x3d0] sm:$0xff]  }
 0x780   : > { %4444 = vmatprep.subr.bf16.mxu1 %v4721_v44  ;;  %v4891_v26 = vpop.eup %4890  ;;  %v2447_v56 = vadd.f32 1.0, %v4889_v23  ;;  %v2495_v50 = vmul.f32 %v2463_v22, %v2367_v21  ;;  %v4750_v23 = vld [vmem:[%s5052_s21 + $0x320] sm:$0xff]   ;;  %v4756_v22 = vld [vmem:[%s5052_s21 + $0x350] sm:$0xff]  }
 0x781   : > { %v2449_v38 = vadd.f32 1.0, %v4891_v26  ;;  %v2497_v44 = vmul.f32 %v2465_v16, %v2369_v15  ;;  %v5823_v62 = vadd.f32 %v5732_v29, %v1810_v54  ;;  %v4753_v26 = vld [vmem:[%s5052_s21 + $0x3d8] sm:$0xff]   ;;  %v4758_v40 = vld [vmem:[%s5052_s21 + $0x310] sm:$0xff]  }
 0x782   : > { %4423 = vmatpush3.bf16.msra.mxu0 %v4722_v52  ;;  %v2762_v52 = vpack.c.bf16 %v2490_v17, %v2474_v10  ;;  %v4759_v16 = vld [vmem:[%s5052_s21 + $0x390] sm:$0xff]   ;;  %v4761_v17 = vld [vmem:[%s5052_s21 + $0x3c8] sm:$0xff]  }
 0x783   : > { %4445 = vmatpush3.bf16.msra.mxu1 %v4723_v53  ;;  %4424 = vmatprep.subr.bf16.mxu0 %v4724_v30  ;;  %v2479_v53 = vmul.f32 %v2447_v56, %v2351_v4  ;;  %v5819_v30 = vadd.f32 %v5727_v12, %v1802_v55  ;;  %v2481_v63 = vmul.f32 %v2449_v38, %v2353_v5  ;;  %v2400_v9 = vmul.f32 0.70710677, %v5823_v62  ;;  %v4764_v38 = vld [vmem:[%s5052_s21 + $0x340] sm:$0xff]  }
 0x784   : > { %4446 = vmatprep.subr.bf16.mxu1 %v4725_v7  ;;  %v2764_v7 = vpack.c.bf16 %v2492_v1, %v2476_v60  ;;  %v4763_v1 = vld [vmem:[%s5052_s21 + $0x388] sm:$0xff]   ;;  %v4766_v60 = vld [vmem:[%s5052_s21 + $0x300] sm:$0xff]  }
 0x785   : > { %v2767_v12 = vpack.c.bf16 %v2495_v50, %v2479_v53  ;;  %v2398_v29 = vmul.f32 0.70710677, %v5819_v30  ;;  %v2368_v50 = vmul.f32 0.5, %v5823_v62 }
 0x786   : > { %4425 = vmatpush3.bf16.msra.mxu0 %v4726_v27  ;;  %v5827_v27 = vadd.f32 %v5703_v34, %v1802_v55  ;;  %v4743_v34 = vld [vmem:[%s5052_s21 + $0x3b0] sm:$0xff]   ;;  %v2366_v55 = vmul.f32 0.5, %v5819_v30 }
 0x787   : > { %4447 = vmatpush3.bf16.msra.mxu1 %v4727_v3  ;;  %4426 = vmatprep.subr.bf16.mxu0 %v4728_v20  ;;  %v5831_v3 = vadd.f32 %v5706_v14, %v1810_v54  ;;  %v2769_v20 = vpack.c.bf16 %v2497_v44, %v2481_v63  ;;  %v4745_v14 = vld [vmem:[%s5052_s21 + $0x3e8] sm:$0xff]   ;;  %4892 = verf.f32 %v2398_v29  ;;  %v4767_v44 = vld [vmem:[%s5052_s21 + $0x380] sm:$0xff]  }
 0x788   : > { %4448 = vmatprep.subr.bf16.mxu1 %v4729_v33  ;;  %v4744_v33 = vld [vmem:[%s5052_s21 + $0x368] sm:$0xff]   ;;  %v2382_v13 = vmul.f32 0.70710677, %v5827_v27  ;;  %4894 = verf.f32 %v2400_v9  ;;  %v2350_v54 = vmul.f32 0.5, %v5827_v27 }
 0x78a   : > { %4427 = vmatpush3.bf16.msra.mxu0 %v4730_v2  ;;  %v2384_v2 = vmul.f32 0.70710677, %v5831_v3  ;;  %4896 = verf.f32 %v2382_v13 }
 0x78b   : > { %4449 = vmatpush3.bf16.msra.mxu1 %v4731_v47  ;;  %4428 = vmatprep.subr.bf16.mxu0 %v4732_v28  ;;  %v4748_v47 = vld [vmem:[%s5052_s21 + $0x360] sm:$0xff]  }
 0x78c   : > { %4450 = vmatprep.subr.bf16.mxu1 %v4733_v48  ;;  %v4749_v28 = vld [vmem:[%s5052_s21 + $0x3e0] sm:$0xff]   ;;  %4898 = verf.f32 %v2384_v2  ;;  %v4752_v48 = vld [vmem:[%s5052_s21 + $0x358] sm:$0xff]  }
 0x78d   : > { %v5868_v2 = vld [vmem:[%s5058_s3] sm:$0xff] }
 0x78e   : > { %4429 = vmatpush3.bf16.msra.mxu0 %v4734_v31  ;;  %v4760_v31 = vld [vmem:[%s5052_s21 + $0x348] sm:$0xff]  }
 0x78f   : > { %4451 = vmatpush3.bf16.msra.mxu1 %v4735_v36  ;;  %4458 = vmatprep.subr.bf16.mxu0 %v4736_v18  ;;  %v4762_v36 = vld [vmem:[%s5052_s21 + $0x308] sm:$0xff]  }
 0x790   : > { %4480 = vmatprep.subr.bf16.mxu1 %v4737_v25  ;;  %v4765_v25 = vld [vmem:[%s5052_s21 + $0x3c0] sm:$0xff]  }
 0x791   : > { %3739 = vmatmul.mubr.bf16.vlgmr.msra.gmra.mxu0 %v2762_v52 }
 0x792   : > { %3780 = vmatmul.mubr.bf16.vlgmr.msra.gmra.mxu1 %v2764_v7  ;;  %4459 = vmatpush3.bf16.msra.mxu0 %v4738_v0  ;;  %v2352_v0 = vmul.f32 0.5, %v5831_v3 }
 0x793   : > { %3820 = vmatprep.mubr.bf16.mxu0 %v2767_v12  ;;  %4481 = vmatpush3.bf16.msra.mxu1 %v4739_v11 }
 0x794   : > { %3861 = vmatprep.mubr.bf16.mxu1 %v2769_v20  ;;  %4460 = vmatprep.subr.bf16.mxu0 %v4740_v59  ;;  %v4893_v46 = vpop.eup %4892 }
 0x795   : > { %4482 = vmatprep.subr.bf16.mxu1 %v4741_v19  ;;  %v4895_v56 = vpop.eup %4894  ;;  %v2462_v57 = vadd.f32 1.0, %v4893_v46 }
 0x796   : > { %4461 = vmatpush3.bf16.msra.mxu0 %v4742_v35  ;;  %v2464_v15 = vadd.f32 1.0, %v4895_v56 }
 0x797   : > { %4483 = vmatpush3.bf16.msra.mxu1 %v4743_v34  ;;  %4462 = vmatprep.subr.bf16.mxu0 %v4744_v33  ;;  %v4897_v21 = vpop.eup %4896  ;;  %v2494_v5 = vmul.f32 %v2462_v57, %v2366_v55 }
 0x798   : > { %4484 = vmatprep.subr.bf16.mxu1 %v4745_v14  ;;  %v2446_v10 = vadd.f32 1.0, %v4897_v21  ;;  %v2496_v52 = vmul.f32 %v2464_v15, %v2368_v50 }
 0x799   : > { %v4899_v18 = vpop.eup %4898 }
 0x79a   : > { %4463 = vmatpush3.bf16.msra.mxu0 %v4746_v42  ;;  %v2448_v4 = vadd.f32 1.0, %v4899_v18  ;;  %v2478_v53 = vmul.f32 %v2446_v10, %v2350_v54  ;;  %v2773_v42 = vrot.slane %v5868_v2, %v5564_v24 }
 0x79b   : > { %4485 = vmatpush3.bf16.msra.mxu1 %v4747_v41  ;;  %4464 = vmatprep.subr.bf16.mxu0 %v4748_v47 }
 0x79c   : > { %4486 = vmatprep.subr.bf16.mxu1 %v4749_v28  ;;  %v2480_v11 = vmul.f32 %v2448_v4, %v2352_v0  ;;  %v2766_v7 = vpack.c.bf16 %v2494_v5, %v2478_v53 }
 0x79e   : > { %4465 = vmatpush3.bf16.msra.mxu0 %v4750_v23  ;;  %v2768_v30 = vpack.c.bf16 %v2496_v52, %v2480_v11 }
 0x79f   : > { %4487 = vmatpush3.bf16.msra.mxu1 %v4751_v61  ;;  %4466 = vmatprep.subr.bf16.mxu0 %v4752_v48 }
 0x7a0   : > { %4488 = vmatprep.subr.bf16.mxu1 %v4753_v26 }
 0x7a2   : > { %4467 = vmatpush3.bf16.msra.mxu0 %v4754_v43 }
 0x7a3   : > { %4489 = vmatpush3.bf16.msra.mxu1 %v4755_v51  ;;  %4468 = vmatprep.subr.bf16.mxu0 %v4756_v22 }
 0x7a4   : > { %4490 = vmatprep.subr.bf16.mxu1 %v4757_v45 }
 0x7a6   : > { %4469 = vmatpush3.bf16.msra.mxu0 %v4758_v40 }
 0x7a7   : > { %4491 = vmatpush3.bf16.msra.mxu1 %v4759_v16  ;;  %4470 = vmatprep.subr.bf16.mxu0 %v4760_v31 }
 0x7a8   : > { %4492 = vmatprep.subr.bf16.mxu1 %v4761_v17 }
 0x7aa   : > { %4471 = vmatpush3.bf16.msra.mxu0 %v4762_v36 }
 0x7ab   : > { %4493 = vmatpush3.bf16.msra.mxu1 %v4763_v1  ;;  %4472 = vmatprep.subr.bf16.mxu0 %v4764_v38 }
 0x7ac   : > { %4494 = vmatprep.subr.bf16.mxu1 %v4765_v25 }
 0x7ae   : > { %4473 = vmatpush3.bf16.msra.mxu0 %v4766_v60 }
 0x7af   : > { %4495 = vmatpush3.bf16.msra.mxu1 %v4767_v44 }
 0x7b1   : > { %3821 = vmatmul.mubr.bf16.vlgmr.msra.gmra.mxu0 %v2766_v7 }
 0x7b2   : > { %3862 = vmatmul.mubr.bf16.vlgmr.msra.gmra.mxu1 %v2768_v30 }
 0x811   : > { %v4342_v63 = vpop.f32.mrf.mxu0  ;;  %v4364_v62 = vpop.f32.mrf.mxu1 }
 0x813   : > { %v4343_v59 = vpop.f32.mrf.mxu0  ;;  %v4365_v27 = vpop.f32.mrf.mxu1 }
 0x814   : > { %v4344_v41 = vadd.f32 %v4343_v59, %v4342_v63  ;;  %v4366_v43 = vadd.f32 %v4365_v27, %v4364_v62 }
 0x815   : > { %v4345_v12 = vpop.f32.mrf.mxu0  ;;  %v4367_v19 = vpop.f32.mrf.mxu1 }
 0x816   : > { %v3577_v23 = vadd.f32 %v4344_v41, %v2773_v42 }
 0x817   : > { %v4346_v20 = vpop.f32.mrf.mxu0  ;;  %v4368_v3 = vpop.f32.mrf.mxu1 }
 0x818   : > { %v4347_v61 = vadd.f32 %v4346_v20, %v4345_v12  ;;  %v3618_v22 = vadd.f32 %v4366_v43, %v3577_v23  ;;  %v4369_v31 = vadd.f32 %v4368_v3, %v4367_v19 }
 0x81a   : > { %v3580_v45 = vadd.f32 %v4347_v61, %v2773_v42 }
 0x81c   : > { %v3621_v56 = vadd.f32 %v4369_v31, %v3580_v45  ;;  %v3907_v31 = vrot.slane %v5868_v2, %v5583_v37 }
 0x831   : > { %v4386_v35 = vpop.f32.mrf.mxu0  ;;  %v4408_v29 = vpop.f32.mrf.mxu1 }
 0x833   : > { %v4387_v34 = vpop.f32.mrf.mxu0  ;;  %v4409_v33 = vpop.f32.mrf.mxu1 }
 0x834   : > { %v4388_v51 = vadd.f32 %v4387_v34, %v4386_v35  ;;  %v4410_v21 = vadd.f32 %v4409_v33, %v4408_v29 }
 0x835   : > { %v4389_v9 = vpop.f32.mrf.mxu0  ;;  %v4411_v14 = vpop.f32.mrf.mxu1 }
 0x836   : > { %v3659_v46 = vadd.f32 %v4388_v51, %v3618_v22 }
 0x837   : > { %v4390_v13 = vpop.f32.mrf.mxu0  ;;  %v4412_v28 = vpop.f32.mrf.mxu1 }
 0x838   : > { %v4391_v17 = vadd.f32 %v4390_v13, %v4389_v9  ;;  %v3700_v57 = vadd.f32 %v4410_v21, %v3659_v46  ;;  %v4413_v38 = vadd.f32 %v4412_v28, %v4411_v14 }
 0x83a   : > { %v3662_v1 = vadd.f32 %v4391_v17, %v3621_v56 }
 0x83c   : > { %v3703_v4 = vadd.f32 %v4413_v38, %v3662_v1 }
 0x851   : > { %v4430_v47 = vpop.f32.mrf.mxu0 }
 0x852   : > { %v4452_v48 = vpop.f32.mrf.mxu1 }
 0x853   : > { %v4431_v26 = vpop.f32.mrf.mxu0 }
 0x854   : > { %v4453_v40 = vpop.f32.mrf.mxu1  ;;  %v4432_v36 = vadd.f32 %v4431_v26, %v4430_v47 }
 0x855   : > { %v4433_v16 = vpop.f32.mrf.mxu0  ;;  %v4454_v50 = vadd.f32 %v4453_v40, %v4452_v48  ;;  %v3901_v40 = vrot.slane %v5868_v2, %v5614_v39 }
 0x856   : > { %v4455_v24 = vpop.f32.mrf.mxu1  ;;  %v3741_v15 = vadd.f32 %v4432_v36, %v3700_v57 }
 0x857   : > { %v4434_v18 = vpop.f32.mrf.mxu0 }
 0x858   : > { %v4435_v25 = vadd.f32 %v4434_v18, %v4433_v16  ;;  %v4456_v10 = vpop.f32.mrf.mxu1  ;;  %v3782_v5 = vadd.f32 %v4454_v50, %v3741_v15 }
 0x859   : > { %v4457_v11 = vadd.f32 %v4456_v10, %v4455_v24 }
 0x85a   : > { %v3744_v44 = vadd.f32 %v4435_v25, %v3703_v4 }
 0x85c   : > { %v3785_v59 = vadd.f32 %v4457_v11, %v3744_v44 }
 0x871   : > { %v4474_v55 = vpop.f32.mrf.mxu0 }
 0x872   : > { %v4496_v60 = vpop.f32.mrf.mxu1 }
 0x873   : > { %v4475_v54 = vpop.f32.mrf.mxu0 }
 0x874   : > { %v4476_v0 = vadd.f32 %v4475_v54, %v4474_v55  ;;  %v4497_v52 = vpop.f32.mrf.mxu1 }
 0x875   : > { %v4477_v53 = vpop.f32.mrf.mxu0  ;;  %v4498_v30 = vadd.f32 %v4497_v52, %v4496_v60 }
 0x876   : > { %v3823_v7 = vadd.f32 %v4476_v0, %v3782_v5  ;;  %v4499_v63 = vpop.f32.mrf.mxu1 }
 0x877   : > { %v4478_v62 = vpop.f32.mrf.mxu0 }
 0x878   : > { %v3864_v27 = vadd.f32 %v4498_v30, %v3823_v7  ;;  %v4479_v12 = vadd.f32 %v4478_v62, %v4477_v53  ;;  %v4500_v19 = vpop.f32.mrf.mxu1 }
 0x879   : > { %v4501_v35 = vadd.f32 %v4500_v19, %v4499_v63 }
 0x87a   : > { %v3826_v20 = vadd.f32 %v4479_v12, %v3785_v59  ;;  %v3870_v3 = vadd.f32 %v3864_v27, %v5480_v8 }
 0x87c   : > { %v3867_v29 = vadd.f32 %v4501_v35, %v3826_v20  ;;  %v3872_v34 = vsel %vm501_vm2, %v3870_v3, 0.0 }
 0x87d   : > { %3873 = vadd.xlane.f32.xlu0 %v3872_v34 }
 0x87e   : > { %v3871_v33 = vadd.f32 %v3867_v29, %v5482_v32 }
 0x880   : > { %v3875_v9 = vsel %vm501_vm2, %v3871_v33, 0.0 }
 0x881   : > { %3876 = vadd.xlane.f32.xlu1 %v3875_v9 }
 0x906   : > { %v3874_v14 = vpop.xlane.xlu0 %3873 }
 0x907   : > { %v3878_v13 = vmul.f32 0.03125, %v3874_v14 }
 0x909   : > { %v3880_v42 = vsub.f32 %v3870_v3, %v3878_v13 }
 0x90a   : > { %v3877_v41 = vpop.xlane.xlu1 %3876 }
 0x90b   : > { %v3879_v47 = vmul.f32 0.03125, %v3877_v41  ;;  %v3882_v28 = vmul.f32 %v3880_v42, %v3880_v42 }
 0x90d   : > { %v3881_v23 = vsub.f32 %v3871_v33, %v3879_v47  ;;  %v3884_v61 = vsel %vm501_vm2, %v3882_v28, 0.0 }
 0x90e   : > { %3885 = vadd.xlane.f32.xlu0 %v3884_v61 }
 0x90f   : > { %v3883_v8 = vmul.f32 %v3881_v23, %v3881_v23 }
 0x911   : > { %v3887_v48 = vsel %vm501_vm2, %v3883_v8, 0.0 }
 0x912   : > { %3888 = vadd.xlane.f32.xlu1 %v3887_v48 }
 0x997   : > { %v3886_v26 = vpop.xlane.xlu0 %3885 }
 0x998   : > { %v3890_v43 = vmul.f32 0.03125, %v3886_v26 }
 0x99a   : > { %v3892_v32 = vadd.f32 1e-05, %v3890_v43 }
 0x99b   : > { %v3889_v51 = vpop.xlane.xlu1 %3888 }
 0x99c   : > { %4900 = vrsqrt.f32 %v3892_v32  ;;  %v3891_v22 = vmul.f32 0.03125, %v3889_v51 }
 0x99e   : > { %v3893_v45 = vadd.f32 1e-05, %v3891_v22 }
 0x9a0   : > { %4902 = vrsqrt.f32 %v3893_v45 }
 0x9a9   : > { %v4901_v16 = vpop.eup %4900 }
 0x9aa   : > { %v3896_v46 = vmul.f32 %v4901_v16, %v3880_v42 }
 0x9ac   : > { %v3902_v17 = vmul.f32 %v3901_v40, %v3896_v46 }
 0x9ad   : > { %v4903_v56 = vpop.eup %4902 }
 0x9ae   : > { %v3908_v21 = vadd.f32 %v3907_v31, %v3902_v17  ;;  %v3897_v36 = vmul.f32 %v4903_v56, %v3881_v23 }
 0x9b0   : > { %3910 = vst.msk [vmem:[#allocation2] sm:$0xff] %vm501_vm2, %v3908_v21  ;;  %v3903_v24 = vmul.f32 %v3901_v40, %v3897_v36  ;;  %3915 = sbr.rel (%p4279_p5) target bundleno = 2798 (0xaee), region = 68 }
 0x9b2   : > { %v3909_v18 = vadd.f32 %v3907_v31, %v3903_v24 }
 0x9b4   : > { %3911 = vst.msk [vmem:[#allocation2 + $0x8] sm:$0xff] %vm501_vm2, %v3909_v18 }
 0x9b5   : > { %v3916_v39 = vsel %vm501_vm2, %v3908_v21, 0.0  ;;  %v3919_v57 = vsel %vm501_vm2, %v3909_v18, 0.0  ;;  %v3945_v53 = vrot.slane %v5444_v58, %v5617_v49  ;;  %v3951_v7 = vrot.slane %v5444_v58, %v5587_v6 }
 0x9b6   : > { %3917 = vadd.xlane.f32.xlu0 %v3916_v39 }
 0x9ba   : > { %3920 = vadd.xlane.f32.xlu0 %v3919_v57 }
 0xa3f   : > { %v3918_v37 = vpop.xlane.xlu0 %3917 }
 0xa40   : > { %v3922_v2 = vmul.f32 0.03125, %v3918_v37 }
 0xa42   : > { %v3924_v1 = vsub.f32 %v3908_v21, %v3922_v2 }
 0xa43   : > { %v3921_v38 = vpop.xlane.xlu0 %3920 }
 0xa44   : > { %v3923_v15 = vmul.f32 0.03125, %v3921_v38  ;;  %v3926_v25 = vmul.f32 %v3924_v1, %v3924_v1 }
 0xa46   : > { %v3925_v10 = vsub.f32 %v3909_v18, %v3923_v15  ;;  %v3928_v55 = vsel %vm501_vm2, %v3926_v25, 0.0 }
 0xa47   : > { %3929 = vadd.xlane.f32.xlu1 %v3928_v55 }
 0xa48   : > { %v3927_v4 = vmul.f32 %v3925_v10, %v3925_v10 }
 0xa4a   : > { %v3931_v50 = vsel %vm501_vm2, %v3927_v4, 0.0 }
 0xa4b   : > { %3932 = vadd.xlane.f32.xlu1 %v3931_v50 }
 0xad0   : > { %v3930_v60 = vpop.xlane.xlu1 %3929 }
 0xad1   : > { %v3934_v54 = vmul.f32 0.03125, %v3930_v60 }
 0xad3   : > { %v3936_v5 = vadd.f32 1e-05, %v3934_v54 }
 0xad4   : > { %v3933_v44 = vpop.xlane.xlu1 %3932 }
 0xad5   : > { %4907 = vrsqrt.f32 %v3936_v5  ;;  %v3935_v0 = vmul.f32 0.03125, %v3933_v44 }
 0xad7   : > { %v3937_v52 = vadd.f32 1e-05, %v3935_v0 }
 0xad9   : > { %4909 = vrsqrt.f32 %v3937_v52 }
 0xae2   : > { %v4908_v11 = vpop.eup %4907 }
 0xae3   : > { %v3940_v30 = vmul.f32 %v4908_v11, %v3924_v1 }
 0xae5   : > { %v3946_v63 = vmul.f32 %v3945_v53, %v3940_v30 }
 0xae6   : > { %v4910_v62 = vpop.eup %4909 }
 0xae7   : > { %v3952_v59 = vadd.f32 %v3951_v7, %v3946_v63  ;;  %v3941_v27 = vmul.f32 %v4910_v62, %v3925_v10 }
 0xae9   : > { %3954 = vst.msk [vmem:[#allocation3] sm:$0xff] %vm501_vm2, %v3952_v59  ;;  %v3947_v12 = vmul.f32 %v3945_v53, %v3941_v27 }
 0xaeb   : > { %v3953_v19 = vadd.f32 %v3951_v7, %v3947_v12 }
 0xaed   : > { %3955 = vst.msk [vmem:[#allocation3 + $0x8] sm:$0xff] %vm501_vm2, %v3953_v19 }
 0xaee PF: > { %p4618_p6 = scmp.eq.s32.totalorder %s5016_s14, 1  ;;  %s4952_s3 = smov [#allocation3]  }
 0xaef   : > { %s3962_s25 = sshll.u32 %s4952_s3, 4  ;;  %s3963_s25 = int_to_ptr.vmem [resolvable:$true] %s3962_s25 }
 0xaf0   : > { %s4911_s29 = scalar_lea.vmem %s3963_s25, 256  ;;  %p4918_p10 = scmp.lt.s32.totalorder %s3963_s25, %s3963_s25 }
 0xaf1   : > { %p4912_p7 = scmp.ne.s32.totalorder %s3963_s25, %s4911_s29  ;;  %p4919_p11 = scmp.lt.s32.totalorder %s4911_s29, %s4911_s29 }
 0xaf3   : > { %p4913_p8 = pnand %p4912_p7, %p4618_p6  ;;  %p4920_p12 = por %p4919_p11, %p4918_p10 }
 0xaf5   : > { %p4914_p9 = pneg %p4913_p8 }
 0xaf7   : > { %p4921_p13 = pnand %p4920_p12, %p4914_p9 }
 0xaf9   : > { %4924 = shalt.err (!%p4921_p13)
}
 0xafa   : > { %s4953_s12 = smov 128   ;;  %s4954_s21 = smov 8  }
 0xafb   : > { %4615 = dma.vmem_to_hbm [thread:$0]  (%p4618_p6), %s3963_s25, 256, %s5920_s10, [#allocation4], %s4953_s12, %s4953_s12, %s4954_s21  }
 0xafc   : > { %4940 = dma.done.wait (%p4618_p6), [#allocation4], 256  }
 0xafd   : > { %4942 = vsyncadd (%p4618_p6), [#allocation4], 4294967040 }
 0xafe PF: > { %s21_s13 = sadd.s32 1, %s4945_s13  }
 0xaff   : > { %p18_p0 = scmp.ge.s32.totalorder %s21_s13, 4  }
 0xb01   :  { %20 = sbr.rel (!%p18_p0) target bundleno = 3 (0x3), region = 113 }
 0xb06   :  { %3978 = vsyncpa [#allocation4], 1 }
 0xb07   :  { %3980 = vsyncpa [#allocation4 + $0x1], 1 }

</bundles_post_ra>
